<compile_context>
chip_gen: v6e
topology: v6e:2x2x1
jax: 0.10.0
libtpu: 0.0.40
codegen_flags: <defaults>
</compile_context>

<pallas_src>
import functools

import jax
import jax.numpy as jnp
from jax.experimental import pallas as pl
from jax.experimental.pallas import tpu as pltpu


# ----------------------------------------------------------------------------
# Pallas kernel: whole batch in one invocation, all heads fused
# ----------------------------------------------------------------------------
def _temporal_attn_kernel(num_heads, cls, x_ref, embed_ref, wqkv_ref, bqkv_ref,
                          wo_ref, bo_ref, o_ref):
    T, B, D = x_ref.shape
    S = T + 1 if cls else T
    dh = D // num_heads

    pos = embed_ref[0:S, :]                          # (S, D); row 0 = cls embedding if cls

    # Build the (B*S, D) batch-major input slab (cls row = zeros + pos[0]), pos add fused.
    rows = []
    for b in range(B):                               # tiny static unroll
        xb = x_ref[:, b, :]                          # (T, D)
        if cls:
            xb = jnp.concatenate([jnp.zeros((1, D), jnp.float32), xb], axis=0)  # (S, D)
        rows.append(xb + pos)                        # (S, D)
    xf = jnp.concatenate(rows, axis=0)               # (B*S, D)

    # One fused lane-dense QKV projection for every (batch, position) row.
    qkv = jnp.dot(xf, wqkv_ref[...],
                  preferred_element_type=jnp.float32) + bqkv_ref[...]          # (B*S, 3D)

    # Tiny static unroll over (batch, head) attention blocks.
    ctx_rows = []
    for b in range(B):
        qkv_b = qkv[b * S:(b + 1) * S, :]            # (S, 3D)  contiguous sublane slice
        q = qkv_b[:, 0 * D:1 * D]                    # query scale folded into w_qkv/b_qkv
        k = qkv_b[:, 1 * D:2 * D]
        v = qkv_b[:, 2 * D:3 * D]
        head_ctx = []
        for h in range(num_heads):
            sl = slice(h * dh, (h + 1) * dh)
            qh, kh, vh = q[:, sl], k[:, sl], v[:, sl]                          # (S, dh)
            s = jax.lax.dot_general(qh, kh, (((1,), (1,)), ((), ())),
                                    preferred_element_type=jnp.float32)       # (S, S)
            s = s - jnp.max(s, axis=-1, keepdims=True)
            p = jnp.exp(s)
            p = p / jnp.sum(p, axis=-1, keepdims=True)                         # exact softmax
            head_ctx.append(jnp.dot(p, vh, preferred_element_type=jnp.float32))
        ctx_rows.append(jnp.concatenate(head_ctx, axis=-1))                    # (S, D)
    ctx = jnp.concatenate(ctx_rows, axis=0)                                    # (B*S, D)

    # Single batched output projection: one MXU push instead of H accumulations.
    out = jnp.dot(ctx, wo_ref[...],
                  preferred_element_type=jnp.float32) + bo_ref[...]            # (B*S, D)

    # Write straight into the (S, B, D) output layout.
    for b in range(B):
        o_ref[:, b, :] = out[b * S:(b + 1) * S, :]


def pallas_temporal_attention(x_tbd, prepped, num_heads, cls):
    """Fused (pos-embed + cls + MultiheadAttention) forward.

    x_tbd:   (T, B, D) float32, the module's native input layout.
    prepped: dict from prepare_params() — lane-dense, pre-transposed weights.
    Returns: (S, B, D) with S = T + 1 if cls else T.
    """
    assert x_tbd.ndim == 3, "expect (T, B, D) input"
    T, B, D = x_tbd.shape
    assert D % num_heads == 0
    S = T + 1 if cls else T

    kernel = functools.partial(_temporal_attn_kernel, num_heads, cls)
    vmem = lambda: pl.BlockSpec(memory_space=pltpu.MemorySpace.VMEM)

    return pl.pallas_call(
        kernel,
        out_shape=jax.ShapeDtypeStruct((S, B, D), jnp.float32),
        in_specs=[vmem() for _ in range(6)],
        out_specs=vmem(),
    )(x_tbd, prepped["embed"], prepped["w_qkv"], prepped["b_qkv"],
      prepped["w_o"], prepped["b_o"])


# ----------------------------------------------------------------------------
# One-time (init) parameter preparation — NOT on the per-call jitted path
# ----------------------------------------------------------------------------
def prepare_params(raw, dim, num_heads):
    """Lane-dense transposed layouts + 1/sqrt(dh) query scale folded into the Q block."""
    D = dim
    scale = (D // num_heads) ** -0.5
    w_in = jnp.asarray(raw["in_proj_weight"], jnp.float32)        # (3D, D)
    b_in = jnp.asarray(raw["in_proj_bias"], jnp.float32)          # (3D,)
    w_in = jnp.concatenate([w_in[:D] * scale, w_in[D:]], axis=0)  # fold query scale
    b_in = jnp.concatenate([b_in[:D] * scale, b_in[D:]], axis=0)
    return {
        "embed": jnp.asarray(raw["embed"], jnp.float32),                         # (L, D)
        "w_qkv": w_in.T,                                                         # (D, 3D)
        "b_qkv": b_in.reshape(1, 3 * D),                                         # (1, 3D)
        "w_o": jnp.asarray(raw["out_proj_weight"], jnp.float32).T,               # (D, D)
        "b_o": jnp.asarray(raw["out_proj_bias"], jnp.float32).reshape(1, D),     # (1, D)
    }


# ----------------------------------------------------------------------------
# TemporalModule forward — the jitted path is just the pallas_call
# ----------------------------------------------------------------------------
@functools.partial(jax.jit, static_argnames=("num_heads", "cls"))
def temporal_module_forward(x_tbd, prepped, num_heads, cls=True):
    """x_tbd: (T, B, D) float32 — same convention as the PyTorch module."""
    return pallas_temporal_attention(x_tbd, prepped, num_heads, cls)


# ----------------------------------------------------------------------------
# Pure-JAX reference (mirrors torch.nn.MultiheadAttention math) for validation
# ----------------------------------------------------------------------------
def _ref_forward(x_tbd, params, num_heads, cls=True):
    T, B, D = x_tbd.shape
    embed = params["embed"]
    if cls:
        cls_emb = jnp.broadcast_to(embed[0][None, None, :], (1, B, D))
        pos = embed[1:T + 1][:, None, :]
        x = jnp.concatenate([cls_emb, x_tbd + pos], axis=0)
    else:
        x = x_tbd + embed[0:T][:, None, :]
    S = x.shape[0]
    H, dh = num_heads, D // num_heads
    qkv = x @ params["in_proj_weight"].T + params["in_proj_bias"]
    q, k, v = jnp.split(qkv, 3, axis=-1)
    q = q * (dh ** -0.5)
    to_heads = lambda t: t.reshape(S, B * H, dh).transpose(1, 0, 2)
    qh, kh, vh = to_heads(q), to_heads(k), to_heads(v)
    attn = jax.nn.softmax(qh @ kh.transpose(0, 2, 1), axis=-1)
    ctx = (attn @ vh).transpose(1, 0, 2).reshape(S, B, D)
    return ctx @ params["out_proj_weight"].T + params["out_proj_bias"]


# ----------------------------------------------------------------------------
# Main
# ----------------------------------------------------------------------------
if __name__ == "__main__":
    # Module config: TemporalModule(dim=32, numHeads=4, maxLength=8, cls=True)
    dim, num_heads, max_length = 32, 4, 8
    T, B = 8, 2
    n_embed = max_length + 1          # embedding table sized for the cls=True variant

    key = jax.random.PRNGKey(0)
    kx, ke, kw, kb, kow, kob = jax.random.split(key, 6)

    raw_params = {
        "embed": 0.1 * jax.random.normal(ke, (n_embed, dim), jnp.float32),
        "in_proj_weight": 0.1 * jax.random.normal(kw, (3 * dim, dim), jnp.float32),
        "in_proj_bias": 0.05 * jax.random.normal(kb, (3 * dim,), jnp.float32),
        "out_proj_weight": 0.1 * jax.random.normal(kow, (dim, dim), jnp.float32),
        "out_proj_bias": 0.05 * jax.random.normal(kob, (dim,), jnp.float32),
    }
    # One-time init-time prep (weight transposes, bias reshapes, folded query scale).
    prepped = jax.block_until_ready(prepare_params(raw_params, dim, num_heads))

    x = jax.random.normal(kx, (T, B, dim), jnp.float32)       # (T, B, D) like PyTorch input

    for use_cls in (True, False):
        out = jax.block_until_ready(
            temporal_module_forward(x, prepped, num_heads=num_heads, cls=use_cls))
        ref = jax.block_until_ready(_ref_forward(x, raw_params, num_heads, cls=use_cls))
        S = T + 1 if use_cls else T
        assert out.shape == (S, B, dim), out.shape
        max_err = float(jnp.max(jnp.abs(out - ref)))
        assert max_err < 5e-4, f"cls={use_cls}: mismatch vs reference: {max_err}"

    print("KERNEL_OK")
</pallas_src>

<mosaic_0001>
module attributes {stable_mosaic.version = 11 : i64} {
  func.func @_temporal_attn_kernel(%arg0: memref<8x2x32xf32, #tpu.memory_space<vmem>>, %arg1: memref<9x32xf32, #tpu.memory_space<vmem>>, %arg2: memref<32x96xf32, #tpu.memory_space<vmem>>, %arg3: memref<1x96xf32, #tpu.memory_space<vmem>>, %arg4: memref<32x32xf32, #tpu.memory_space<vmem>>, %arg5: memref<1x32xf32, #tpu.memory_space<vmem>>, %arg6: memref<9x2x32xf32, #tpu.memory_space<vmem>>) attributes {dimension_semantics = [], scalar_prefetch = 0 : i64, scratch_operands = 0 : i64, tpu.core_type = #tpu.core_type<tc>} {
    %c0 = arith.constant 0 : index
    %c0_0 = arith.constant 0 : index
    %0 = vector.load %arg1[%c0, %c0_0] : memref<9x32xf32, #tpu.memory_space<vmem>>, vector<9x32xf32>
    %c0_1 = arith.constant 0 : index
    %c0_2 = arith.constant 0 : index
    %c0_3 = arith.constant 0 : index
    %1 = vector.load %arg0[%c0_1, %c0_2, %c0_3] : memref<8x2x32xf32, #tpu.memory_space<vmem>>, vector<8x1x32xf32>
    %2 = vector.shape_cast %1 : vector<8x1x32xf32> to vector<8x32xf32>
    %cst = arith.constant 0.000000e+00 : f32
    %3 = vector.broadcast %cst : f32 to vector<1x32xf32>
    %4 = tpu.concatenate %3, %2 in 0 : vector<1x32xf32>, vector<8x32xf32> -> vector<9x32xf32>
    %5 = arith.addf %4, %0 : vector<9x32xf32>
    %c0_4 = arith.constant 0 : index
    %c1 = arith.constant 1 : index
    %c0_5 = arith.constant 0 : index
    %6 = vector.load %arg0[%c0_4, %c1, %c0_5] : memref<8x2x32xf32, #tpu.memory_space<vmem>>, vector<8x1x32xf32>
    %7 = vector.shape_cast %6 : vector<8x1x32xf32> to vector<8x32xf32>
    %cst_6 = arith.constant 0.000000e+00 : f32
    %8 = vector.broadcast %cst_6 : f32 to vector<1x32xf32>
    %9 = tpu.concatenate %8, %7 in 0 : vector<1x32xf32>, vector<8x32xf32> -> vector<9x32xf32>
    %10 = arith.addf %9, %0 : vector<9x32xf32>
    %11 = tpu.concatenate %5, %10 in 0 : vector<9x32xf32>, vector<9x32xf32> -> vector<18x32xf32>
    %c0_7 = arith.constant 0 : index
    %c0_8 = arith.constant 0 : index
    %12 = vector.load %arg2[%c0_7, %c0_8] : memref<32x96xf32, #tpu.memory_space<vmem>>, vector<32x96xf32>
    %cst_9 = arith.constant dense<0.000000e+00> : vector<18x96xf32>
    %13 = tpu.matmul %11, %12, %cst_9 {dimension_numbers = #tpu.dot_dimension_numbers<[1], [0], [0], [1], [0, 0, 1, 1], [], []>} : vector<18x32xf32>, vector<32x96xf32>, vector<18x96xf32> -> vector<18x96xf32>
    %c0_10 = arith.constant 0 : index
    %c0_11 = arith.constant 0 : index
    %14 = vector.load %arg3[%c0_10, %c0_11] : memref<1x96xf32, #tpu.memory_space<vmem>>, vector<1x96xf32>
    %15 = vector.broadcast %14 : vector<1x96xf32> to vector<18x96xf32>
    %16 = arith.addf %13, %15 : vector<18x96xf32>
    %17 = vector.extract_strided_slice %16 {offsets = [0, 0], sizes = [9, 96], strides = [1, 1]} : vector<18x96xf32> to vector<9x96xf32>
    %18 = vector.extract_strided_slice %17 {offsets = [0, 0], sizes = [9, 32], strides = [1, 1]} : vector<9x96xf32> to vector<9x32xf32>
    %19 = vector.extract_strided_slice %17 {offsets = [0, 32], sizes = [9, 32], strides = [1, 1]} : vector<9x96xf32> to vector<9x32xf32>
    %20 = vector.extract_strided_slice %17 {offsets = [0, 64], sizes = [9, 32], strides = [1, 1]} : vector<9x96xf32> to vector<9x32xf32>
    %21 = vector.extract_strided_slice %18 {offsets = [0, 0], sizes = [9, 8], strides = [1, 1]} : vector<9x32xf32> to vector<9x8xf32>
    %22 = vector.extract_strided_slice %19 {offsets = [0, 0], sizes = [9, 8], strides = [1, 1]} : vector<9x32xf32> to vector<9x8xf32>
    %23 = vector.extract_strided_slice %20 {offsets = [0, 0], sizes = [9, 8], strides = [1, 1]} : vector<9x32xf32> to vector<9x8xf32>
    %cst_12 = arith.constant dense<0.000000e+00> : vector<9x9xf32>
    %24 = tpu.matmul %21, %22, %cst_12 {dimension_numbers = #tpu.dot_dimension_numbers<[1], [1], [0], [0], [0, 0, 1, 0], [], []>} : vector<9x8xf32>, vector<9x8xf32>, vector<9x9xf32> -> vector<9x9xf32>
    %cst_13 = arith.constant dense<0xFF800000> : vector<9xf32>
    %25 = vector.multi_reduction <maximumf>, %24, %cst_13 [1] : vector<9x9xf32> to vector<9xf32>
    %26 = vector.shape_cast %25 : vector<9xf32> to vector<9x1xf32>
    %27 = vector.broadcast %26 : vector<9x1xf32> to vector<9x9xf32>
    %28 = arith.subf %24, %27 : vector<9x9xf32>
    %29 = math.exp %28 : vector<9x9xf32>
    %cst_14 = arith.constant dense<0.000000e+00> : vector<9xf32>
    %30 = vector.multi_reduction <add>, %29, %cst_14 [1] : vector<9x9xf32> to vector<9xf32>
    %31 = vector.shape_cast %30 : vector<9xf32> to vector<9x1xf32>
    %32 = vector.broadcast %31 : vector<9x1xf32> to vector<9x9xf32>
    %33 = arith.divf %29, %32 : vector<9x9xf32>
    %cst_15 = arith.constant dense<0.000000e+00> : vector<9x8xf32>
    %34 = tpu.matmul %33, %23, %cst_15 {dimension_numbers = #tpu.dot_dimension_numbers<[1], [0], [0], [1], [0, 0, 1, 1], [], []>} : vector<9x9xf32>, vector<9x8xf32>, vector<9x8xf32> -> vector<9x8xf32>
    %35 = vector.extract_strided_slice %18 {offsets = [0, 8], sizes = [9, 8], strides = [1, 1]} : vector<9x32xf32> to vector<9x8xf32>
    %36 = vector.extract_strided_slice %19 {offsets = [0, 8], sizes = [9, 8], strides = [1, 1]} : vector<9x32xf32> to vector<9x8xf32>
    %37 = vector.extract_strided_slice %20 {offsets = [0, 8], sizes = [9, 8], strides = [1, 1]} : vector<9x32xf32> to vector<9x8xf32>
    %cst_16 = arith.constant dense<0.000000e+00> : vector<9x9xf32>
    %38 = tpu.matmul %35, %36, %cst_16 {dimension_numbers = #tpu.dot_dimension_numbers<[1], [1], [0], [0], [0, 0, 1, 0], [], []>} : vector<9x8xf32>, vector<9x8xf32>, vector<9x9xf32> -> vector<9x9xf32>
    %cst_17 = arith.constant dense<0xFF800000> : vector<9xf32>
    %39 = vector.multi_reduction <maximumf>, %38, %cst_17 [1] : vector<9x9xf32> to vector<9xf32>
    %40 = vector.shape_cast %39 : vector<9xf32> to vector<9x1xf32>
    %41 = vector.broadcast %40 : vector<9x1xf32> to vector<9x9xf32>
    %42 = arith.subf %38, %41 : vector<9x9xf32>
    %43 = math.exp %42 : vector<9x9xf32>
    %cst_18 = arith.constant dense<0.000000e+00> : vector<9xf32>
    %44 = vector.multi_reduction <add>, %43, %cst_18 [1] : vector<9x9xf32> to vector<9xf32>
    %45 = vector.shape_cast %44 : vector<9xf32> to vector<9x1xf32>
    %46 = vector.broadcast %45 : vector<9x1xf32> to vector<9x9xf32>
    %47 = arith.divf %43, %46 : vector<9x9xf32>
    %cst_19 = arith.constant dense<0.000000e+00> : vector<9x8xf32>
    %48 = tpu.matmul %47, %37, %cst_19 {dimension_numbers = #tpu.dot_dimension_numbers<[1], [0], [0], [1], [0, 0, 1, 1], [], []>} : vector<9x9xf32>, vector<9x8xf32>, vector<9x8xf32> -> vector<9x8xf32>
    %49 = vector.extract_strided_slice %18 {offsets = [0, 16], sizes = [9, 8], strides = [1, 1]} : vector<9x32xf32> to vector<9x8xf32>
    %50 = vector.extract_strided_slice %19 {offsets = [0, 16], sizes = [9, 8], strides = [1, 1]} : vector<9x32xf32> to vector<9x8xf32>
    %51 = vector.extract_strided_slice %20 {offsets = [0, 16], sizes = [9, 8], strides = [1, 1]} : vector<9x32xf32> to vector<9x8xf32>
    %cst_20 = arith.constant dense<0.000000e+00> : vector<9x9xf32>
    %52 = tpu.matmul %49, %50, %cst_20 {dimension_numbers = #tpu.dot_dimension_numbers<[1], [1], [0], [0], [0, 0, 1, 0], [], []>} : vector<9x8xf32>, vector<9x8xf32>, vector<9x9xf32> -> vector<9x9xf32>
    %cst_21 = arith.constant dense<0xFF800000> : vector<9xf32>
    %53 = vector.multi_reduction <maximumf>, %52, %cst_21 [1] : vector<9x9xf32> to vector<9xf32>
    %54 = vector.shape_cast %53 : vector<9xf32> to vector<9x1xf32>
    %55 = vector.broadcast %54 : vector<9x1xf32> to vector<9x9xf32>
    %56 = arith.subf %52, %55 : vector<9x9xf32>
    %57 = math.exp %56 : vector<9x9xf32>
    %cst_22 = arith.constant dense<0.000000e+00> : vector<9xf32>
    %58 = vector.multi_reduction <add>, %57, %cst_22 [1] : vector<9x9xf32> to vector<9xf32>
    %59 = vector.shape_cast %58 : vector<9xf32> to vector<9x1xf32>
    %60 = vector.broadcast %59 : vector<9x1xf32> to vector<9x9xf32>
    %61 = arith.divf %57, %60 : vector<9x9xf32>
    %cst_23 = arith.constant dense<0.000000e+00> : vector<9x8xf32>
    %62 = tpu.matmul %61, %51, %cst_23 {dimension_numbers = #tpu.dot_dimension_numbers<[1], [0], [0], [1], [0, 0, 1, 1], [], []>} : vector<9x9xf32>, vector<9x8xf32>, vector<9x8xf32> -> vector<9x8xf32>
    %63 = vector.extract_strided_slice %18 {offsets = [0, 24], sizes = [9, 8], strides = [1, 1]} : vector<9x32xf32> to vector<9x8xf32>
    %64 = vector.extract_strided_slice %19 {offsets = [0, 24], sizes = [9, 8], strides = [1, 1]} : vector<9x32xf32> to vector<9x8xf32>
    %65 = vector.extract_strided_slice %20 {offsets = [0, 24], sizes = [9, 8], strides = [1, 1]} : vector<9x32xf32> to vector<9x8xf32>
    %cst_24 = arith.constant dense<0.000000e+00> : vector<9x9xf32>
    %66 = tpu.matmul %63, %64, %cst_24 {dimension_numbers = #tpu.dot_dimension_numbers<[1], [1], [0], [0], [0, 0, 1, 0], [], []>} : vector<9x8xf32>, vector<9x8xf32>, vector<9x9xf32> -> vector<9x9xf32>
    %cst_25 = arith.constant dense<0xFF800000> : vector<9xf32>
    %67 = vector.multi_reduction <maximumf>, %66, %cst_25 [1] : vector<9x9xf32> to vector<9xf32>
    %68 = vector.shape_cast %67 : vector<9xf32> to vector<9x1xf32>
    %69 = vector.broadcast %68 : vector<9x1xf32> to vector<9x9xf32>
    %70 = arith.subf %66, %69 : vector<9x9xf32>
    %71 = math.exp %70 : vector<9x9xf32>
    %cst_26 = arith.constant dense<0.000000e+00> : vector<9xf32>
    %72 = vector.multi_reduction <add>, %71, %cst_26 [1] : vector<9x9xf32> to vector<9xf32>
    %73 = vector.shape_cast %72 : vector<9xf32> to vector<9x1xf32>
    %74 = vector.broadcast %73 : vector<9x1xf32> to vector<9x9xf32>
    %75 = arith.divf %71, %74 : vector<9x9xf32>
    %cst_27 = arith.constant dense<0.000000e+00> : vector<9x8xf32>
    %76 = tpu.matmul %75, %65, %cst_27 {dimension_numbers = #tpu.dot_dimension_numbers<[1], [0], [0], [1], [0, 0, 1, 1], [], []>} : vector<9x9xf32>, vector<9x8xf32>, vector<9x8xf32> -> vector<9x8xf32>
    %77 = tpu.concatenate %34, %48, %62, %76 in 1 : vector<9x8xf32>, vector<9x8xf32>, vector<9x8xf32>, vector<9x8xf32> -> vector<9x32xf32>
    %78 = vector.extract_strided_slice %16 {offsets = [9, 0], sizes = [9, 96], strides = [1, 1]} : vector<18x96xf32> to vector<9x96xf32>
    %79 = vector.extract_strided_slice %78 {offsets = [0, 0], sizes = [9, 32], strides = [1, 1]} : vector<9x96xf32> to vector<9x32xf32>
    %80 = vector.extract_strided_slice %78 {offsets = [0, 32], sizes = [9, 32], strides = [1, 1]} : vector<9x96xf32> to vector<9x32xf32>
    %81 = vector.extract_strided_slice %78 {offsets = [0, 64], sizes = [9, 32], strides = [1, 1]} : vector<9x96xf32> to vector<9x32xf32>
    %82 = vector.extract_strided_slice %79 {offsets = [0, 0], sizes = [9, 8], strides = [1, 1]} : vector<9x32xf32> to vector<9x8xf32>
    %83 = vector.extract_strided_slice %80 {offsets = [0, 0], sizes = [9, 8], strides = [1, 1]} : vector<9x32xf32> to vector<9x8xf32>
    %84 = vector.extract_strided_slice %81 {offsets = [0, 0], sizes = [9, 8], strides = [1, 1]} : vector<9x32xf32> to vector<9x8xf32>
    %cst_28 = arith.constant dense<0.000000e+00> : vector<9x9xf32>
    %85 = tpu.matmul %82, %83, %cst_28 {dimension_numbers = #tpu.dot_dimension_numbers<[1], [1], [0], [0], [0, 0, 1, 0], [], []>} : vector<9x8xf32>, vector<9x8xf32>, vector<9x9xf32> -> vector<9x9xf32>
    %cst_29 = arith.constant dense<0xFF800000> : vector<9xf32>
    %86 = vector.multi_reduction <maximumf>, %85, %cst_29 [1] : vector<9x9xf32> to vector<9xf32>
    %87 = vector.shape_cast %86 : vector<9xf32> to vector<9x1xf32>
    %88 = vector.broadcast %87 : vector<9x1xf32> to vector<9x9xf32>
    %89 = arith.subf %85, %88 : vector<9x9xf32>
    %90 = math.exp %89 : vector<9x9xf32>
    %cst_30 = arith.constant dense<0.000000e+00> : vector<9xf32>
    %91 = vector.multi_reduction <add>, %90, %cst_30 [1] : vector<9x9xf32> to vector<9xf32>
    %92 = vector.shape_cast %91 : vector<9xf32> to vector<9x1xf32>
    %93 = vector.broadcast %92 : vector<9x1xf32> to vector<9x9xf32>
    %94 = arith.divf %90, %93 : vector<9x9xf32>
    %cst_31 = arith.constant dense<0.000000e+00> : vector<9x8xf32>
    %95 = tpu.matmul %94, %84, %cst_31 {dimension_numbers = #tpu.dot_dimension_numbers<[1], [0], [0], [1], [0, 0, 1, 1], [], []>} : vector<9x9xf32>, vector<9x8xf32>, vector<9x8xf32> -> vector<9x8xf32>
    %96 = vector.extract_strided_slice %79 {offsets = [0, 8], sizes = [9, 8], strides = [1, 1]} : vector<9x32xf32> to vector<9x8xf32>
    %97 = vector.extract_strided_slice %80 {offsets = [0, 8], sizes = [9, 8], strides = [1, 1]} : vector<9x32xf32> to vector<9x8xf32>
    %98 = vector.extract_strided_slice %81 {offsets = [0, 8], sizes = [9, 8], strides = [1, 1]} : vector<9x32xf32> to vector<9x8xf32>
    %cst_32 = arith.constant dense<0.000000e+00> : vector<9x9xf32>
    %99 = tpu.matmul %96, %97, %cst_32 {dimension_numbers = #tpu.dot_dimension_numbers<[1], [1], [0], [0], [0, 0, 1, 0], [], []>} : vector<9x8xf32>, vector<9x8xf32>, vector<9x9xf32> -> vector<9x9xf32>
    %cst_33 = arith.constant dense<0xFF800000> : vector<9xf32>
    %100 = vector.multi_reduction <maximumf>, %99, %cst_33 [1] : vector<9x9xf32> to vector<9xf32>
    %101 = vector.shape_cast %100 : vector<9xf32> to vector<9x1xf32>
    %102 = vector.broadcast %101 : vector<9x1xf32> to vector<9x9xf32>
    %103 = arith.subf %99, %102 : vector<9x9xf32>
    %104 = math.exp %103 : vector<9x9xf32>
    %cst_34 = arith.constant dense<0.000000e+00> : vector<9xf32>
    %105 = vector.multi_reduction <add>, %104, %cst_34 [1] : vector<9x9xf32> to vector<9xf32>
    %106 = vector.shape_cast %105 : vector<9xf32> to vector<9x1xf32>
    %107 = vector.broadcast %106 : vector<9x1xf32> to vector<9x9xf32>
    %108 = arith.divf %104, %107 : vector<9x9xf32>
    %cst_35 = arith.constant dense<0.000000e+00> : vector<9x8xf32>
    %109 = tpu.matmul %108, %98, %cst_35 {dimension_numbers = #tpu.dot_dimension_numbers<[1], [0], [0], [1], [0, 0, 1, 1], [], []>} : vector<9x9xf32>, vector<9x8xf32>, vector<9x8xf32> -> vector<9x8xf32>
    %110 = vector.extract_strided_slice %79 {offsets = [0, 16], sizes = [9, 8], strides = [1, 1]} : vector<9x32xf32> to vector<9x8xf32>
    %111 = vector.extract_strided_slice %80 {offsets = [0, 16], sizes = [9, 8], strides = [1, 1]} : vector<9x32xf32> to vector<9x8xf32>
    %112 = vector.extract_strided_slice %81 {offsets = [0, 16], sizes = [9, 8], strides = [1, 1]} : vector<9x32xf32> to vector<9x8xf32>
    %cst_36 = arith.constant dense<0.000000e+00> : vector<9x9xf32>
    %113 = tpu.matmul %110, %111, %cst_36 {dimension_numbers = #tpu.dot_dimension_numbers<[1], [1], [0], [0], [0, 0, 1, 0], [], []>} : vector<9x8xf32>, vector<9x8xf32>, vector<9x9xf32> -> vector<9x9xf32>
    %cst_37 = arith.constant dense<0xFF800000> : vector<9xf32>
    %114 = vector.multi_reduction <maximumf>, %113, %cst_37 [1] : vector<9x9xf32> to vector<9xf32>
    %115 = vector.shape_cast %114 : vector<9xf32> to vector<9x1xf32>
    %116 = vector.broadcast %115 : vector<9x1xf32> to vector<9x9xf32>
    %117 = arith.subf %113, %116 : vector<9x9xf32>
    %118 = math.exp %117 : vector<9x9xf32>
    %cst_38 = arith.constant dense<0.000000e+00> : vector<9xf32>
    %119 = vector.multi_reduction <add>, %118, %cst_38 [1] : vector<9x9xf32> to vector<9xf32>
    %120 = vector.shape_cast %119 : vector<9xf32> to vector<9x1xf32>
    %121 = vector.broadcast %120 : vector<9x1xf32> to vector<9x9xf32>
    %122 = arith.divf %118, %121 : vector<9x9xf32>
    %cst_39 = arith.constant dense<0.000000e+00> : vector<9x8xf32>
    %123 = tpu.matmul %122, %112, %cst_39 {dimension_numbers = #tpu.dot_dimension_numbers<[1], [0], [0], [1], [0, 0, 1, 1], [], []>} : vector<9x9xf32>, vector<9x8xf32>, vector<9x8xf32> -> vector<9x8xf32>
    %124 = vector.extract_strided_slice %79 {offsets = [0, 24], sizes = [9, 8], strides = [1, 1]} : vector<9x32xf32> to vector<9x8xf32>
    %125 = vector.extract_strided_slice %80 {offsets = [0, 24], sizes = [9, 8], strides = [1, 1]} : vector<9x32xf32> to vector<9x8xf32>
    %126 = vector.extract_strided_slice %81 {offsets = [0, 24], sizes = [9, 8], strides = [1, 1]} : vector<9x32xf32> to vector<9x8xf32>
    %cst_40 = arith.constant dense<0.000000e+00> : vector<9x9xf32>
    %127 = tpu.matmul %124, %125, %cst_40 {dimension_numbers = #tpu.dot_dimension_numbers<[1], [1], [0], [0], [0, 0, 1, 0], [], []>} : vector<9x8xf32>, vector<9x8xf32>, vector<9x9xf32> -> vector<9x9xf32>
    %cst_41 = arith.constant dense<0xFF800000> : vector<9xf32>
    %128 = vector.multi_reduction <maximumf>, %127, %cst_41 [1] : vector<9x9xf32> to vector<9xf32>
    %129 = vector.shape_cast %128 : vector<9xf32> to vector<9x1xf32>
    %130 = vector.broadcast %129 : vector<9x1xf32> to vector<9x9xf32>
    %131 = arith.subf %127, %130 : vector<9x9xf32>
    %132 = math.exp %131 : vector<9x9xf32>
    %cst_42 = arith.constant dense<0.000000e+00> : vector<9xf32>
    %133 = vector.multi_reduction <add>, %132, %cst_42 [1] : vector<9x9xf32> to vector<9xf32>
    %134 = vector.shape_cast %133 : vector<9xf32> to vector<9x1xf32>
    %135 = vector.broadcast %134 : vector<9x1xf32> to vector<9x9xf32>
    %136 = arith.divf %132, %135 : vector<9x9xf32>
    %cst_43 = arith.constant dense<0.000000e+00> : vector<9x8xf32>
    %137 = tpu.matmul %136, %126, %cst_43 {dimension_numbers = #tpu.dot_dimension_numbers<[1], [0], [0], [1], [0, 0, 1, 1], [], []>} : vector<9x9xf32>, vector<9x8xf32>, vector<9x8xf32> -> vector<9x8xf32>
    %138 = tpu.concatenate %95, %109, %123, %137 in 1 : vector<9x8xf32>, vector<9x8xf32>, vector<9x8xf32>, vector<9x8xf32> -> vector<9x32xf32>
    %139 = tpu.concatenate %77, %138 in 0 : vector<9x32xf32>, vector<9x32xf32> -> vector<18x32xf32>
    %c0_44 = arith.constant 0 : index
    %c0_45 = arith.constant 0 : index
    %140 = vector.load %arg4[%c0_44, %c0_45] : memref<32x32xf32, #tpu.memory_space<vmem>>, vector<32x32xf32>
    %cst_46 = arith.constant dense<0.000000e+00> : vector<18x32xf32>
    %141 = tpu.matmul %139, %140, %cst_46 {dimension_numbers = #tpu.dot_dimension_numbers<[1], [0], [0], [1], [0, 0, 1, 1], [], []>} : vector<18x32xf32>, vector<32x32xf32>, vector<18x32xf32> -> vector<18x32xf32>
    %c0_47 = arith.constant 0 : index
    %c0_48 = arith.constant 0 : index
    %142 = vector.load %arg5[%c0_47, %c0_48] : memref<1x32xf32, #tpu.memory_space<vmem>>, vector<1x32xf32>
    %143 = vector.broadcast %142 : vector<1x32xf32> to vector<18x32xf32>
    %144 = arith.addf %141, %143 : vector<18x32xf32>
    %145 = vector.extract_strided_slice %144 {offsets = [0, 0], sizes = [9, 32], strides = [1, 1]} : vector<18x32xf32> to vector<9x32xf32>
    %c0_49 = arith.constant 0 : index
    %c0_50 = arith.constant 0 : index
    %c0_51 = arith.constant 0 : index
    %146 = vector.load %arg6[%c0_49, %c0_50, %c0_51] : memref<9x2x32xf32, #tpu.memory_space<vmem>>, vector<9x1x32xf32>
    %147 = vector.shape_cast %146 : vector<9x1x32xf32> to vector<9x32xf32>
    %148 = vector.shape_cast %145 : vector<9x32xf32> to vector<9x1x32xf32>
    tpu.vector_store %arg6[%c0_49, %c0_50, %c0_51], %148 {strides = array<i32>} : memref<9x2x32xf32, #tpu.memory_space<vmem>>, vector<9x1x32xf32>,
    %149 = vector.extract_strided_slice %144 {offsets = [9, 0], sizes = [9, 32], strides = [1, 1]} : vector<18x32xf32> to vector<9x32xf32>
    %c0_52 = arith.constant 0 : index
    %c1_53 = arith.constant 1 : index
    %c0_54 = arith.constant 0 : index
    %150 = vector.load %arg6[%c0_52, %c1_53, %c0_54] : memref<9x2x32xf32, #tpu.memory_space<vmem>>, vector<9x1x32xf32>
    %151 = vector.shape_cast %150 : vector<9x1x32xf32> to vector<9x32xf32>
    %152 = vector.shape_cast %149 : vector<9x32xf32> to vector<9x1x32xf32>
    tpu.vector_store %arg6[%c0_52, %c1_53, %c0_54], %152 {strides = array<i32>} : memref<9x2x32xf32, #tpu.memory_space<vmem>>, vector<9x1x32xf32>,
    return
  }
}

</mosaic_0001>

<bundles_post_ra>
// kernel: temporal_module_forward.1
= control target key start
LH: loop header
LB: loop body
LE: loop exit
PB: predicated region body
PF: predicated region fallthrough
CT: control target
= control target key end

     0   :  { %11 = vsyncpa [#allocation3], 0  ;;  %s3193_s0 = inlined_call_operand.hbm [shape: f32[8,2,32], index: 0, kind: input, shape index: {}]   ;;  %s3194_s1 = inlined_call_operand.hbm [shape: f32[9,32], index: 1, kind: input, shape index: {}]   ;;  %s3195_s2 = inlined_call_operand.hbm [shape: f32[32,96], index: 2, kind: input, shape index: {}]   ;;  %s3196_s3 = inlined_call_operand.vmem [shape: f32[1,96], index: 3, kind: input, shape index: {}]   ;;  %s3197_s4 = inlined_call_operand.hbm [shape: f32[32,32], index: 4, kind: input, shape index: {}]   ;;  %s3198_s5 = inlined_call_operand.hbm [shape: f32[1,32], index: 5, kind: input, shape index: {}]   ;;  %s3199_s6 = inlined_call_operand.hbm [shape: f32[9,2,32], index: 6, kind: output, shape index: {}]  }
   0x1   :  { %12 = vsyncpa [#allocation6], 0 }
   0x2   :  { %13 = vsyncpa [#allocation9], 0 }
   0x3   :  { %14 = vsyncpa [#allocation4], 0  ;;  %s2737_s21 = smov [#allocation5]  }
   0x4   :  { %s32_s22 = sshll.u32 %s2737_s21, 4  ;;  %s33_s22 = int_to_ptr.vmem [resolvable:$true] %s32_s22 }
   0x5   :  { %s2617_s23 = scalar_lea.vmem %s33_s22, 256  ;;  %p2622_p1 = scmp.lt.s32.totalorder %s33_s22, %s33_s22 }
   0x6   :  { %p2618_p0 = scmp.ne.s32.totalorder %s33_s22, %s2617_s23  ;;  %p2623_p2 = scmp.lt.s32.totalorder %s2617_s23, %s2617_s23 }
   0x8   :  { %p2624_p3 = por %p2623_p2, %p2622_p1 }
   0xa   :  { %p2625_p4 = pnand %p2624_p3, %p2618_p0 }
   0xc   :  { %2628 = shalt.err (!%p2625_p4)
}
   0xd   :  { %s2738_s24 = smov 128   ;;  %s2739_s25 = smov 8  }
   0xe   :  { %38 = dma.hbm_to_vmem [thread:$0]  %s3194_s1, 256, %s33_s22, [#allocation6], %s2738_s24, %s2738_s24, %s2739_s25  }
   0xf   :  { %s2740_s28 = smov [#allocation8]   ;;  %s2741_s30 = smov [#allocation2]  }
  0x10   :  { %s58_s29 = sshll.u32 %s2740_s28, 4  ;;  %s20_s7 = sshll.u32 %s2741_s30, 4  ;;  %s59_s29 = int_to_ptr.vmem [resolvable:$true] %s58_s29  ;;  %s21_s7 = int_to_ptr.vmem [resolvable:$true] %s20_s7 }
  0x11   :  { %s2637_s8 = scalar_lea.vmem %s59_s29, 512  ;;  %p2642_p6 = scmp.lt.s32.totalorder %s59_s29, %s59_s29 }
  0x12   :  { %p2638_p5 = scmp.ne.s32.totalorder %s59_s29, %s2637_s8  ;;  %p2643_p7 = scmp.lt.s32.totalorder %s2637_s8, %s2637_s8 }
  0x14   :  { %p2644_p8 = por %p2643_p7, %p2642_p6 }
  0x16   :  { %p2645_p9 = pnand %p2644_p8, %p2638_p5 }
  0x18   :  { %2648 = shalt.err (!%p2645_p9)
}
  0x19   :  { %64 = dma.hbm_to_vmem [thread:$0]  %s3197_s4, 512, %s59_s29, [#allocation9], %s2738_s24, %s2738_s24, %s2739_s25  }
  0x1a   :  { %s2657_s1 = scalar_lea.vmem %s21_s7, 256  ;;  %p2662_p11 = scmp.lt.s32.totalorder %s21_s7, %s21_s7 }
  0x1b   :  { %p2658_p10 = scmp.ne.s32.totalorder %s21_s7, %s2657_s1  ;;  %p2663_p12 = scmp.lt.s32.totalorder %s2657_s1, %s2657_s1 }
  0x1d   :  { %p2664_p13 = por %p2663_p12, %p2662_p11 }
  0x1f   :  { %p2665_p0 = pnand %p2664_p13, %p2658_p10 }
  0x21   :  { %2668 = shalt.err (!%p2665_p0)
}
  0x22   :  { %s2742_s11 = smov 32   ;;  %s2743_s12 = smov 2  }
  0x23   :  { %26 = dma.hbm_to_vmem [thread:$0]  %s3193_s0, 256, %s21_s7, [#allocation3], %s2742_s11, %s2742_s11, %s2743_s12  }
  0x24   :  { %s2744_s15 = smov [#allocation7]   ;;  %s2745_s4 = smov [#allocation10]  }
  0x25   :  { %s44_s16 = sshll.u32 %s2744_s15, 4  ;;  %s71_s17 = sshll.u32 %s2745_s4, 4  ;;  %s45_s16 = int_to_ptr.vmem [resolvable:$true] %s44_s16  ;;  %s72_s17 = int_to_ptr.vmem [resolvable:$true] %s71_s17 }
  0x26   :  { %s2677_s18 = scalar_lea.vmem %s45_s16, 512  ;;  %p2682_p2 = scmp.lt.s32.totalorder %s45_s16, %s45_s16 }
  0x27   :  { %p2678_p1 = scmp.ne.s32.totalorder %s45_s16, %s2677_s18  ;;  %p2683_p3 = scmp.lt.s32.totalorder %s2677_s18, %s2677_s18 }
  0x29   :  { %p2684_p4 = por %p2683_p3, %p2682_p2 }
  0x2b   :  { %p2685_p5 = pnand %p2684_p4, %p2678_p1 }
  0x2d   :  { %2688 = shalt.err (!%p2685_p5)
}
  0x2e   :  { %50 = dma.hbm_to_vmem [thread:$0]  %s3195_s2, 512, %s45_s16, [#allocation6], %s2738_s24, %s2738_s24, %s2739_s25  }
  0x2f   :  { %s2697_s0 = scalar_lea.vmem %s72_s17, 16  ;;  %s2701_s21 = scalar_lea.vmem %s72_s17, 32 }
  0x30   :  { %p2698_p6 = scmp.ne.s32.totalorder %s72_s17, %s2697_s0  ;;  %p2702_p7 = scmp.lt.s32.totalorder %s72_s17, %s72_s17 }
  0x31   :  { %p2703_p8 = scmp.lt.s32.totalorder %s2701_s21, %s2697_s0 }
  0x33   :  { %p2704_p9 = por %p2703_p8, %p2702_p7 }
  0x35   :  { %p2705_p10 = pnand %p2704_p9, %p2698_p6 }
  0x37   :  { %2708 = shalt.err (!%p2705_p10)
}
  0x38   :  { %74 = dma.hbm_to_vmem [thread:$0]  %s3198_s5, 16, %s72_s17, [#allocation9]  }
  0x39   :  { %2729 = dma.done.wait [#allocation3], 256  }
  0x3a   :  { %2730 = vsyncadd [#allocation3], 4294967040 }
  0x3b   :  { %2731 = dma.done.wait [#allocation6], 768  }
  0x3c   :  { %2732 = vsyncadd [#allocation6], 4294966528 }
  0x3d   :  { %2733 = dma.done.wait [#allocation9], 528  }
  0x3e   :  { %2734 = vsyncadd [#allocation9], 4294966768  ;;  %v2746_v0 = vmov 0.0   ;;  %vm2747_vm0 = vmmov 0   ;;  %v177_v1 = vld [vmem:[#allocation7 + $0x18] sm:$0xff]  ;;  %v176_v2 = vld [vmem:[#allocation7 + $0x10] sm:$0xff] }
  0x3f   :  { %2373 = vmatprep.subr.mxu0 %v2746_v0  ;;  %2381 = vmatprep.mubr.msk.f32.mxu0 %vm2747_vm0, %v2746_v0  ;;  %vm110_vm1 = vcmask 1042434   ;;  %vm113_vm2 = vcmask 1043459   ;;  %v175_v3 = vld [vmem:[#allocation7 + $0x8] sm:$0xff]  ;;  %v92_v4 = vld [vmem:[#allocation2] sm:$0x1]  ;;  %vm116_vm3 = vcmask 1044484  }
  0x40   :  { %2374 = vmatpush3.msra.mxu0 %v177_v1  ;;  %vm119_vm4 = vcmask 1045509   ;;  %vm122_vm5 = vcmask 1046534   ;;  %v93_v5 = vld [vmem:[#allocation2 + $0x2] sm:$0x1]  ;;  %v94_v6 = vld [vmem:[#allocation2 + $0x4] sm:$0x1] }
  0x41   :  { %2375 = vmatprep.subr.mxu0 %v2746_v0  ;;  %v95_v7 = vld [vmem:[#allocation2 + $0x6] sm:$0x1]  ;;  %v96_v8 = vld [vmem:[#allocation2 + $0x8] sm:$0x1]  ;;  %v97_v9 = vld [vmem:[#allocation2 + $0xa] sm:$0x1] }
  0x42   :  { %2376 = vmatpush3.msra.mxu0 %v176_v2  ;;  %v98_v10 = vld [vmem:[#allocation2 + $0xc] sm:$0x1]  ;;  %v174_v11 = vld [vmem:[#allocation7] sm:$0xff]  ;;  %v108_v12 = vrot.slane %v92_v4, 7  ;;  %v109_v13 = vrot.slane %v93_v5, 6  ;;  %v112_v14 = vrot.slane %v94_v6, 5 }
  0x43   :  { %2377 = vmatprep.subr.mxu0 %v2746_v0  ;;  %v115_v15 = vrot.slane %v95_v7, 4  ;;  %v118_v16 = vrot.slane %v96_v8, 3  ;;  %v121_v17 = vrot.slane %v97_v9, 2  ;;  %v124_v18 = vrot.slane %v98_v10, 1  ;;  %v133_v20 = vld [vmem:[#allocation2 + $0x1] sm:$0x1] }
  0x44   :  { %2378 = vmatpush3.msra.mxu0 %v175_v3  ;;  %vm125_vm6 = vcmask 1047559   ;;  %v111_v19 = vsel %vm110_vm1, %v109_v13, %v108_v12  ;;  %v134_v21 = vld [vmem:[#allocation2 + $0x3] sm:$0x1]  ;;  %v135_v22 = vld [vmem:[#allocation2 + $0x5] sm:$0x1]  ;;  %v149_v29 = vrot.slane %v133_v20, 7 }
  0x45   :  { %2379 = vmatprep.subr.mxu0 %v2746_v0  ;;  %v114_v23 = vsel %vm113_vm2, %v112_v14, %v111_v19  ;;  %v136_v24 = vld [vmem:[#allocation2 + $0x7] sm:$0x1]  ;;  %v137_v25 = vld [vmem:[#allocation2 + $0x9] sm:$0x1]  ;;  %v138_v26 = vld [vmem:[#allocation2 + $0xb] sm:$0x1] }
  0x46   :  { %2380 = vmatpush3.msra.mxu0 %v174_v11  ;;  %v117_v27 = vsel %vm116_vm3, %v115_v15, %v114_v23  ;;  %v139_v28 = vld [vmem:[#allocation2 + $0xd] sm:$0x1]  ;;  %v150_v30 = vrot.slane %v134_v21, 6  ;;  %v152_v31 = vrot.slane %v135_v22, 5  ;;  %vm129_vm7 = vcmask 1040384   ;;  %v90_v35 = vld [vmem:[#allocation5] sm:$0xff] }
  0x47   :  { %v120_v32 = vsel %vm119_vm4, %v118_v16, %v117_v27  ;;  %v154_v33 = vrot.slane %v136_v24, 4  ;;  %v156_v34 = vrot.slane %v137_v25, 3  ;;  %v158_v38 = vrot.slane %v138_v26, 2  ;;  %v140_v44 = vld [vmem:[#allocation2 + $0xf] sm:$0x1]  ;;  %s2748_s24 = smov 88  }
  0x48   :  { %v123_v36 = vsel %vm122_vm5, %v121_v17, %v120_v32  ;;  %v151_v37 = vsel %vm110_vm1, %v150_v30, %v149_v29  ;;  %v160_v41 = vrot.slane %v139_v28, 1  ;;  %vm185_vm8 = vcmask 261120   ;;  %v91_v47 = vld [vmem:[#allocation5 + $0x8] sm:$0x1]  ;;  %v99_v48 = vld [vmem:[#allocation2 + $0xe] sm:$0x1] }
  0x49   :  { %v126_v39 = vsel %vm125_vm6, %v124_v18, %v123_v36  ;;  %v153_v40 = vsel %vm113_vm2, %v152_v31, %v151_v37  ;;  %v166_v51 = vadd.f32 %v140_v44, %v91_v47  ;;  %v132_v53 = vadd.f32 %v99_v48, %v91_v47  ;;  %v2231_v59 = vld [vmem:[%s3196_s3] ss:$0 sm:$0xff]  ;;  %s2749_s26 = smov 96   ;;  %s2750_s3 = smov 120  }
  0x4a   :  { %v130_v42 = vsel %vm129_vm7, 0.0, %v126_v39  ;;  %v155_v43 = vsel %vm116_vm3, %v154_v33, %v153_v40  ;;  %vm280_vm9 = vcmask 64512   ;;  %vm368_vm10 = vcmask 65536   ;;  %s2751_s27 = smov 64   ;;  %s2752_s28 = smov 56  }
  0x4b   :  { %v131_v45 = vadd.f32 %v130_v42, %v90_v35  ;;  %v157_v46 = vsel %vm119_vm4, %v156_v34, %v155_v43  ;;  %v170_v56 = vrot.slane %v166_v51, 7  ;;  %vm364_vm11 = vcmask 72704   ;;  %s2753_s29 = smov 80   ;;  %s2754_s30 = smov 112  }
  0x4c   :  { %v159_v49 = vsel %vm122_vm5, %v158_v38, %v157_v46  ;;  %s2755_s7 = smov 48   ;;  %s2756_s8 = smov 72   ;;  %vm1112_vm12 = vcmask 1046528   ;;  %vm1105_vm13 = vcmask 130048   ;;  %vm1108_vm14 = vcmask 195584  }
  0x4d   :  { %2382 = vmatmul.mubr.msk.f32.vlgmr.msra.gmra.mxu0 %vm185_vm8, %v131_v45  ;;  %v161_v50 = vsel %vm125_vm6, %v160_v41, %v159_v49  ;;  %s2757_s9 = smov 104   ;;  %s2758_s10 = smov 40   ;;  %vm2126_vm15 = vcmask 253952  }
  0x4e   :  { %2384 = vmatprep.mubr.msk.f32.mxu0 %vm2747_vm0, %v2746_v0  ;;  %v164_v52 = vsel %vm129_vm7, 0.0, %v161_v50  ;;  %s2759_s1 = smov 16   ;;  %s2760_s13 = smov 24  }
  0x4f   :  { %v165_v54 = vadd.f32 %v164_v52, %v90_v35 }
  0x51   :  { %v169_v55 = vrot.slane %v165_v54, 7 }
  0x53   :  { %v173_v57 = vsel %vm129_vm7, %v132_v53, %v169_v55  ;;  %v171_v58 = vsel %vm129_vm7, %v169_v55, %v170_v56 }
  0x54   :  { %2385 = vmatmul.mubr.msk.f32.gmra.mxu0 %vm185_vm8, %v173_v57 }
  0x55   :  { %2387 = vmatprep.mubr.msk.f32.mxu0 %vm2747_vm0, %v2746_v0 }
  0x58   :  { %2388 = vmatmul.mubr.msk.f32.gmra.mxu0 %vm185_vm8, %v171_v58 }
 0x10d   :  { %v260_v60 = vpop.f32.mrf.mxu0 }
 0x10e   :  { %v2857_v61 = vadd.f32 %v2231_v59, %v260_v60 }
 0x10f   :  { %v2383_v62 = vpop.f32.mrf.mxu0 }
 0x110   :  { %2394 = vmatprep.mubr.msk.f32.mxu0 %vm280_vm9, %v2857_v61 }
 0x114   :  { %v265_v63 = vpop.f32.mrf.mxu0 }
 0x115   :  { %v2861_v1 = vadd.f32 %v2231_v59, %v265_v63 }
 0x116   :  { %v2386_v2 = vpop.f32.mrf.mxu0 }
 0x117   :  { %482 = vrot.lane.b32.xlu1 %v2861_v1, %s2748_s24  ;;  %278 = vrot.lane.b32.xlu0 %v2861_v1, %s2749_s26 }
 0x118   :  { %v270_v3 = vpop.f32.mrf.mxu0 }
 0x119   :  { %v2867_v4 = vadd.f32 %v2231_v59, %v270_v3 }
 0x11a   :  { %v2389_v5 = vpop.f32.mrf.mxu0 }
 0x11b   :  { %480 = vrot.lane.b32.xlu1 %v2857_v61, %s2748_s24  ;;  %276 = vrot.lane.b32.xlu0 %v2857_v61, %s2749_s26 }
 0x11f   :  { %478 = vrot.lane.b32.xlu1 %v2861_v1, %s2750_s3  ;;  %476 = vrot.lane.b32.xlu0 %v2857_v61, %s2750_s3 }
 0x189   :  { %v279_v6 = vpop.permute.xlu0 %278  ;;  %v483_v7 = vpop.permute.xlu1 %482 }
 0x18a   :  { %2390 = vmatprep.subr.msk.mxu0 %vm280_vm9, %v279_v6 }
 0x18b   :  { %2391 = vmatpush3.xpose.msk.msra.mxu0 %vm280_vm9, %v279_v6 }
 0x18d   :  { %v277_v8 = vpop.permute.xlu0 %276  ;;  %v481_v10 = vpop.permute.xlu1 %480 }
 0x18e   :  { %2392 = vmatprep.subr.msk.mxu0 %vm280_vm9, %v277_v8 }
 0x18f   :  { %2393 = vmatpush3.xpose.msk.msra.mxu0 %vm280_vm9, %v277_v8 }
 0x190   :  { %2404 = vmatprep.subr.msk.mxu0 %vm280_vm9, %v483_v7 }
 0x191   :  { %v477_v9 = vpop.permute.xlu0 %476  ;;  %v479_v11 = vpop.permute.xlu1 %478 }
 0x192   :  { %2395 = vmatmul.mubr.msk.f32.vlgmr.msra.gmra.mxu0 %vm280_vm9, %v2861_v1 }
 0x193   :  { %2405 = vmatpush3.xpose.msk.msra.mxu0 %vm280_vm9, %v483_v7  ;;  %2408 = vmatprep.mubr.msk.f32.mxu0 %vm280_vm9, %v477_v9 }
 0x194   :  { %2406 = vmatprep.subr.msk.mxu0 %vm280_vm9, %v481_v10 }
 0x197   :  { %2407 = vmatpush3.xpose.msk.msra.mxu0 %vm280_vm9, %v481_v10 }
 0x19a   :  { %2409 = vmatmul.mubr.msk.f32.vlgmr.msra.gmra.mxu0 %vm280_vm9, %v479_v11 }
 0x252   :  { %v2396_v12 = vpop.f32.mrf.mxu0 }
 0x253   :  { %v369_v13 = vsel %vm368_vm10, %v2396_v12, -inf }
 0x254   :  { %370 = vmax.xlane.f32.xlu1 %v369_v13  ;;  %v355_v14 = vpop.f32.mrf.mxu0 }
 0x255   :  { %v365_v15 = vsel %vm364_vm11, %v355_v14, -inf }
 0x256   :  { %366 = vmax.xlane.f32.xlu0 %v365_v15 }
 0x25a   :  { %v2410_v16 = vpop.f32.mrf.mxu0 }
 0x25b   :  { %v570_v19 = vsel %vm368_vm10, %v2410_v16, -inf }
 0x25c   :  { %v558_v17 = vpop.f32.mrf.mxu0 }
 0x25d   :  { %v567_v18 = vsel %vm364_vm11, %v558_v17, -inf }
 0x25e   :  { %568 = vmax.xlane.f32.xlu0 %v567_v18 }
 0x262   :  { %571 = vmax.xlane.f32.xlu0 %v570_v19 }
 0x265   :  { %390 = vrot.lane.b32.xlu1 %v2861_v1, %s2751_s27 }
 0x269   :  { %591 = vrot.lane.b32.xlu1 %v2861_v1, %s2752_s28 }
 0x26d   :  { %589 = vrot.lane.b32.xlu1 %v2857_v61, %s2752_s28 }
 0x278   :  { %388 = vrot.lane.b32.xlu0 %v2857_v61, %s2751_s27 }
 0x2dd   :  { %v371_v20 = vpop.xlane.xlu1 %370 }
 0x2de   :  { %v373_v21 = vsub.f32 %v2396_v12, %v371_v20 }
 0x2df   :  { %v367_v22 = vpop.xlane.xlu0 %366 }
 0x2e0   :  { %v376_v23 = vmul.f32 1.442695, %v373_v21  ;;  %v372_v24 = vsub.f32 %v355_v14, %v367_v22 }
 0x2e1   :  { %v391_v25 = vpop.permute.xlu1 %390 }
 0x2e2   :  { %2545 = vpow2.f32 %v376_v23  ;;  %v374_v26 = vmul.f32 1.442695, %v372_v24  ;;  %2397 = vmatprep.subr.msk.mxu1 %vm129_vm7, %v391_v25 }
 0x2e3   :  { %2398 = vmatpush3.msk.msra.mxu1 %vm129_vm7, %v391_v25 }
 0x2e4   :  { %2547 = vpow2.f32 %v374_v26 }
 0x2e5   :  { %v592_v35 = vpop.permute.xlu1 %591 }
 0x2e7   :  { %v569_v27 = vpop.xlane.xlu0 %568 }
 0x2e8   :  { %v573_v39 = vsub.f32 %v558_v17, %v569_v27 }
 0x2e9   :  { %v590_v43 = vpop.permute.xlu1 %589 }
 0x2ea   :  { %v575_v40 = vmul.f32 1.442695, %v573_v39 }
 0x2eb   :  { %v572_v28 = vpop.xlane.xlu0 %571 }
 0x2ec   :  { %v574_v29 = vsub.f32 %v2410_v16, %v572_v28 }
 0x2ee   :  { %v577_v30 = vmul.f32 1.442695, %v574_v29 }
 0x2ef   :  { %v2546_v31 = vpop.eup %2545  ;;  %v389_v32 = vpop.permute.xlu0 %388 }
 0x2f0   :  { %2549 = vpow2.f32 %v577_v30  ;;  %2399 = vmatprep.subr.mxu1 %v389_v32  ;;  %v381_v33 = vsel %vm368_vm10, %v2546_v31, 0.0 }
 0x2f1   :  { %v2548_v34 = vpop.eup %2547  ;;  %382 = vadd.xlane.f32.xlu0 %v381_v33  ;;  %2400 = vmatpush3.msra.mxu1 %v389_v32  ;;  %2551 = vpow2.f32 %v575_v40 }
 0x2f2   :  { %2411 = vmatprep.subr.msk.mxu1 %vm129_vm7, %v592_v35  ;;  %v378_v36 = vsel %vm364_vm11, %v2548_v34, 0.0 }
 0x2f3   :  { %379 = vadd.xlane.f32.xlu1 %v378_v36  ;;  %v2970_v36 = vrot.slane %v2867_v4, 1 }
 0x2fd   :  { %v2550_v37 = vpop.eup %2549 }
 0x2fe   :  { %v582_v38 = vsel %vm368_vm10, %v2550_v37, 0.0  ;;  %v2552_v41 = vpop.eup %2551 }
 0x2ff   :  { %583 = vadd.xlane.f32.xlu0 %v582_v38  ;;  %v579_v42 = vsel %vm364_vm11, %v2552_v41, 0.0 }
 0x304   :  { %681 = vrot.lane.b32.xlu1 %v2857_v61, %s2753_s29 }
 0x315   :  { %683 = vrot.lane.b32.xlu0 %v2861_v1, %s2753_s29 }
 0x319   :  { %677 = vrot.lane.b32.xlu0 %v2857_v61, %s2754_s30 }
 0x328   :  { %580 = vadd.xlane.f32.xlu1 %v579_v42 }
 0x339   :  { %679 = vrot.lane.b32.xlu1 %v2861_v1, %s2754_s30 }
 0x37a   :  { %v383_v44 = vpop.xlane.xlu0 %382 }
 0x37b   :  { %2553 = vrcp.f32 %v383_v44 }
 0x37c   :  { %v380_v45 = vpop.xlane.xlu1 %379 }
 0x37d   :  { %2555 = vrcp.f32 %v380_v45 }
 0x380   :  { %v682_v52 = vpop.permute.xlu1 %681 }
 0x388   :  { %v2554_v46 = vpop.eup %2553  ;;  %v584_v48 = vpop.xlane.xlu0 %583 }
 0x389   :  { %v387_v50 = vmul.f32 %v2554_v46, %v2546_v31  ;;  %2557 = vrcp.f32 %v584_v48 }
 0x38a   :  { %v2556_v47 = vpop.eup %2555 }
 0x38b   :  { %v385_v49 = vmul.f32 %v2556_v47, %v2548_v34 }
 0x38c   :  { %v684_v51 = vpop.permute.xlu0 %683 }
 0x38d   :  { %2401 = vmatprep.mubr.msk.f32.mxu1 %vm364_vm11, %v385_v49 }
 0x38e   :  { %2402 = vmatmul.mubr.msk.f32.vlgmr.msra.gmra.mxu1 %vm364_vm11, %v387_v50 }
 0x38f   :  { %2412 = vmatpush3.msk.msra.mxu1 %vm129_vm7, %v592_v35 }
 0x390   :  { %2413 = vmatprep.subr.mxu1 %v590_v43  ;;  %v678_v58 = vpop.permute.xlu0 %677 }
 0x391   :  { %2414 = vmatpush3.msra.mxu1 %v590_v43 }
 0x392   :  { %2418 = vmatprep.subr.msk.mxu1 %vm280_vm9, %v684_v51 }
 0x396   :  { %v2558_v54 = vpop.eup %2557 }
 0x397   :  { %v588_v57 = vmul.f32 %v2558_v54, %v2550_v37  ;;  %v1113_v37 = vrot.slane %v2861_v1, 1 }
 0x399   :  { %v2976_v38 = vsel %vm1112_vm12, %v1113_v37, %v2970_v36 }
 0x3b1   :  { %v581_v53 = vpop.xlane.xlu1 %580 }
 0x3b2   :  { %2559 = vrcp.f32 %v581_v53 }
 0x3b5   :  { %v680_v59 = vpop.permute.xlu1 %679 }
 0x3bf   :  { %v2560_v55 = vpop.eup %2559 }
 0x3c0   :  { %v586_v56 = vmul.f32 %v2560_v55, %v2552_v41 }
 0x3c2   :  { %2415 = vmatprep.mubr.msk.f32.mxu1 %vm364_vm11, %v586_v56 }
 0x3c3   :  { %2416 = vmatmul.mubr.msk.f32.vlgmr.msra.gmra.mxu1 %vm364_vm11, %v588_v57 }
 0x3c4   :  { %2419 = vmatpush3.xpose.msk.msra.mxu1 %vm280_vm9, %v684_v51  ;;  %2422 = vmatprep.mubr.msk.f32.mxu1 %vm280_vm9, %v678_v58 }
 0x3c5   :  { %2420 = vmatprep.subr.msk.mxu1 %vm280_vm9, %v682_v52 }
 0x3c8   :  { %2421 = vmatpush3.xpose.msk.msra.mxu1 %vm280_vm9, %v682_v52 }
 0x3cb   :  { %2423 = vmatmul.mubr.msk.f32.vlgmr.msra.gmra.mxu1 %vm280_vm9, %v680_v59 }
 0x44e   :  { %v2927_v60 = vpop.f32.mrf.mxu1 }
 0x450   :  { %v2929_v62 = vpop.f32.mrf.mxu1 }
 0x483   :  { %v2931_v63 = vpop.f32.mrf.mxu1 }
 0x485   :  { %v2933_v2 = vpop.f32.mrf.mxu1 }
 0x48b   :  { %v2424_v3 = vpop.f32.mrf.mxu1 }
 0x48c   :  { %v771_v5 = vsel %vm368_vm10, %v2424_v3, -inf }
 0x48d   :  { %772 = vmax.xlane.f32.xlu1 %v771_v5  ;;  %v759_v6 = vpop.f32.mrf.mxu1 }
 0x48e   :  { %v768_v7 = vsel %vm364_vm11, %v759_v6, -inf }
 0x48f   :  { %769 = vmax.xlane.f32.xlu0 %v768_v7 }
 0x49e   :  { %792 = vrot.lane.b32.xlu1 %v2861_v1, %s2755_s7 }
 0x4a2   :  { %884 = vrot.lane.b32.xlu1 %v2861_v1, %s2756_s8 }
 0x4a6   :  { %882 = vrot.lane.b32.xlu1 %v2857_v61, %s2756_s8 }
 0x4aa   :  { %880 = vrot.lane.b32.xlu1 %v2861_v1, %s2757_s9 }
 0x516   :  { %v773_v8 = vpop.xlane.xlu1 %772 }
 0x517   :  { %v775_v9 = vsub.f32 %v2424_v3, %v773_v8 }
 0x518   :  { %v770_v10 = vpop.xlane.xlu0 %769 }
 0x519   :  { %v778_v11 = vmul.f32 1.442695, %v775_v9  ;;  %v774_v12 = vsub.f32 %v759_v6, %v770_v10 }
 0x51a   :  { %v793_v13 = vpop.permute.xlu1 %792 }
 0x51b   :  { %2561 = vpow2.f32 %v778_v11  ;;  %v776_v14 = vmul.f32 1.442695, %v774_v12  ;;  %2425 = vmatprep.subr.msk.mxu0 %vm129_vm7, %v793_v13 }
 0x51c   :  { %2426 = vmatpush3.msk.msra.mxu0 %vm129_vm7, %v793_v13 }
 0x51d   :  { %2563 = vpow2.f32 %v776_v14 }
 0x51e   :  { %v885_v22 = vpop.permute.xlu1 %884 }
 0x522   :  { %v883_v28 = vpop.permute.xlu1 %882 }
 0x526   :  { %v881_v29 = vpop.permute.xlu1 %880 }
 0x528   :  { %v2562_v15 = vpop.eup %2561 }
 0x529   :  { %v783_v16 = vsel %vm368_vm10, %v2562_v15, 0.0 }
 0x52a   :  { %v2564_v17 = vpop.eup %2563  ;;  %784 = vadd.xlane.f32.xlu0 %v783_v16 }
 0x52b   :  { %v780_v18 = vsel %vm364_vm11, %v2564_v17, 0.0 }
 0x52e   :  { %781 = vadd.xlane.f32.xlu0 %v780_v18 }
 0x544   :  { %790 = vrot.lane.b32.xlu0 %v2857_v61, %s2755_s7 }
 0x548   :  { %878 = vrot.lane.b32.xlu0 %v2857_v61, %s2757_s9 }
 0x5b3   :  { %v785_v19 = vpop.xlane.xlu0 %784 }
 0x5b4   :  { %2565 = vrcp.f32 %v785_v19 }
 0x5b7   :  { %v782_v20 = vpop.xlane.xlu0 %781 }
 0x5b8   :  { %2567 = vrcp.f32 %v782_v20 }
 0x5bb   :  { %v791_v21 = vpop.permute.xlu0 %790 }
 0x5bc   :  { %2427 = vmatprep.subr.mxu0 %v791_v21 }
 0x5bd   :  { %2428 = vmatpush3.msra.mxu0 %v791_v21 }
 0x5be   :  { %2432 = vmatprep.subr.msk.mxu0 %vm280_vm9, %v885_v22 }
 0x5bf   :  { %v879_v27 = vpop.permute.xlu0 %878 }
 0x5c1   :  { %v2566_v23 = vpop.eup %2565 }
 0x5c2   :  { %v789_v26 = vmul.f32 %v2566_v23, %v2562_v15 }
 0x5c5   :  { %v2568_v24 = vpop.eup %2567 }
 0x5c6   :  { %v787_v25 = vmul.f32 %v2568_v24, %v2564_v17 }
 0x5c8   :  { %2429 = vmatprep.mubr.msk.f32.mxu0 %vm364_vm11, %v787_v25 }
 0x5c9   :  { %2430 = vmatmul.mubr.msk.f32.vlgmr.msra.gmra.mxu0 %vm364_vm11, %v789_v26 }
 0x5ca   :  { %2433 = vmatpush3.xpose.msk.msra.mxu0 %vm280_vm9, %v885_v22  ;;  %2436 = vmatprep.mubr.msk.f32.mxu0 %vm280_vm9, %v879_v27 }
 0x5cb   :  { %2434 = vmatprep.subr.msk.mxu0 %vm280_vm9, %v883_v28 }
 0x5ce   :  { %2435 = vmatpush3.xpose.msk.msra.mxu0 %vm280_vm9, %v883_v28 }
 0x5d1   :  { %2437 = vmatmul.mubr.msk.f32.vlgmr.msra.gmra.mxu0 %vm280_vm9, %v881_v29 }
 0x689   :  { %v2961_v30 = vpop.f32.mrf.mxu0 }
 0x68b   :  { %v2963_v31 = vpop.f32.mrf.mxu0 }
 0x691   :  { %v2438_v32 = vpop.f32.mrf.mxu0 }
 0x692   :  { %v972_v33 = vsel %vm368_vm10, %v2438_v32, -inf }
 0x693   :  { %973 = vmax.xlane.f32.xlu1 %v972_v33  ;;  %v960_v34 = vpop.f32.mrf.mxu0 }
 0x694   :  { %v969_v35 = vsel %vm364_vm11, %v960_v34, -inf }
 0x695   :  { %970 = vmax.xlane.f32.xlu0 %v969_v35 }
 0x6a4   :  { %993 = vrot.lane.b32.xlu1 %v2861_v1, %s2758_s10 }
 0x6a8   :  { %1118 = vrot.lane.b32.xlu1 %v2970_v36, %s2749_s26 }
 0x6ac   :  { %1116 = vrot.lane.b32.xlu1 %v2976_v38, %s2749_s26 }
 0x71c   :  { %v974_v39 = vpop.xlane.xlu1 %973 }
 0x71d   :  { %v976_v40 = vsub.f32 %v2438_v32, %v974_v39 }
 0x71e   :  { %v971_v41 = vpop.xlane.xlu0 %970 }
 0x71f   :  { %v979_v42 = vmul.f32 1.442695, %v976_v40  ;;  %v975_v43 = vsub.f32 %v960_v34, %v971_v41 }
 0x720   :  { %v994_v44 = vpop.permute.xlu1 %993 }
 0x721   :  { %2569 = vpow2.f32 %v979_v42  ;;  %v977_v4 = vmul.f32 1.442695, %v975_v43  ;;  %2439 = vmatprep.subr.msk.mxu1 %vm129_vm7, %v994_v44 }
 0x722   :  { %2440 = vmatpush3.msk.msra.mxu1 %vm129_vm7, %v994_v44 }
 0x723   :  { %2571 = vpow2.f32 %v977_v4 }
 0x724   :  { %v1119_v51 = vpop.permute.xlu1 %1118 }
 0x728   :  { %v1117_v56 = vpop.permute.xlu1 %1116 }
 0x72e   :  { %v2570_v1 = vpop.eup %2569 }
 0x72f   :  { %v984_v45 = vsel %vm368_vm10, %v2570_v1, 0.0 }
 0x730   :  { %v2572_v46 = vpop.eup %2571  ;;  %985 = vadd.xlane.f32.xlu0 %v984_v45 }
 0x731   :  { %v981_v47 = vsel %vm364_vm11, %v2572_v46, 0.0 }
 0x734   :  { %982 = vadd.xlane.f32.xlu0 %v981_v47 }
 0x74a   :  { %991 = vrot.lane.b32.xlu0 %v2857_v61, %s2758_s10 }
 0x7b9   :  { %v986_v48 = vpop.xlane.xlu0 %985 }
 0x7ba   :  { %2573 = vrcp.f32 %v986_v48 }
 0x7bd   :  { %v983_v49 = vpop.xlane.xlu0 %982 }
 0x7be   :  { %2575 = vrcp.f32 %v983_v49 }
 0x7c1   :  { %v992_v50 = vpop.permute.xlu0 %991 }
 0x7c2   :  { %2441 = vmatprep.subr.mxu1 %v992_v50 }
 0x7c3   :  { %2442 = vmatpush3.msra.mxu1 %v992_v50 }
 0x7c4   :  { %2446 = vmatprep.subr.msk.mxu1 %vm280_vm9, %v1119_v51 }
 0x7c7   :  { %v2574_v52 = vpop.eup %2573 }
 0x7c8   :  { %v990_v55 = vmul.f32 %v2574_v52, %v2570_v1 }
 0x7cb   :  { %v2576_v53 = vpop.eup %2575 }
 0x7cc   :  { %v988_v54 = vmul.f32 %v2576_v53, %v2572_v46 }
 0x7ce   :  { %2443 = vmatprep.mubr.msk.f32.mxu1 %vm364_vm11, %v988_v54 }
 0x7cf   :  { %2444 = vmatmul.mubr.msk.f32.vlgmr.msra.gmra.mxu1 %vm364_vm11, %v990_v55 }
 0x7d0   :  { %2447 = vmatpush3.xpose.msk.msra.mxu1 %vm280_vm9, %v1119_v51  ;;  %2450 = vmatprep.mubr.msk.f32.mxu1 %vm280_vm9, %v2976_v38 }
 0x7d1   :  { %2448 = vmatprep.subr.msk.mxu1 %vm280_vm9, %v1117_v56 }
 0x7d4   :  { %2449 = vmatpush3.xpose.msk.msra.mxu1 %vm280_vm9, %v1117_v56 }
 0x7d7   :  { %2451 = vmatmul.mubr.msk.f32.vlgmr.msra.gmra.mxu1 %vm280_vm9, %v2970_v36 }
 0x88f   :  { %v2996_v61 = vpop.f32.mrf.mxu1 }
 0x891   :  { %v2998_v57 = vpop.f32.mrf.mxu1 }
 0x897   :  { %v2452_v58 = vpop.f32.mrf.mxu1 }
 0x898   :  { %v1206_v59 = vsel %vm368_vm10, %v2452_v58, -inf }
 0x899   :  { %1207 = vmax.xlane.f32.xlu1 %v1206_v59  ;;  %v1194_v3 = vpop.f32.mrf.mxu1 }
 0x89a   :  { %v1203_v5 = vsel %vm364_vm11, %v1194_v3, -inf }
 0x89b   :  { %1204 = vmax.xlane.f32.xlu0 %v1203_v5 }
 0x8aa   :  { %1227 = vrot.lane.b32.xlu1 %v2970_v36, %s2751_s27 }
 0x8ae   :  { %1319 = vrot.lane.b32.xlu1 %v2970_v36, %s2748_s24 }
 0x8b2   :  { %1317 = vrot.lane.b32.xlu1 %v2976_v38, %s2748_s24 }
 0x8b6   :  { %1315 = vrot.lane.b32.xlu1 %v2970_v36, %s2750_s3 }
 0x922   :  { %v1208_v6 = vpop.xlane.xlu1 %1207 }
 0x923   :  { %v1210_v7 = vsub.f32 %v2452_v58, %v1208_v6 }
 0x924   :  { %v1205_v8 = vpop.xlane.xlu0 %1204 }
 0x925   :  { %v1213_v9 = vmul.f32 1.442695, %v1210_v7  ;;  %v1209_v10 = vsub.f32 %v1194_v3, %v1205_v8 }
 0x926   :  { %v1228_v11 = vpop.permute.xlu1 %1227 }
 0x927   :  { %2577 = vpow2.f32 %v1213_v9  ;;  %v1211_v12 = vmul.f32 1.442695, %v1209_v10  ;;  %2453 = vmatprep.subr.msk.mxu0 %vm129_vm7, %v1228_v11 }
 0x928   :  { %2454 = vmatpush3.msk.msra.mxu0 %vm129_vm7, %v1228_v11 }
 0x929   :  { %2579 = vpow2.f32 %v1211_v12 }
 0x92a   :  { %v1320_v20 = vpop.permute.xlu1 %1319 }
 0x92e   :  { %v1318_v26 = vpop.permute.xlu1 %1317 }
 0x932   :  { %v1316_v27 = vpop.permute.xlu1 %1315 }
 0x934   :  { %v2578_v13 = vpop.eup %2577 }
 0x935   :  { %v1218_v14 = vsel %vm368_vm10, %v2578_v13, 0.0 }
 0x936   :  { %v2580_v15 = vpop.eup %2579  ;;  %1219 = vadd.xlane.f32.xlu0 %v1218_v14 }
 0x937   :  { %v1215_v16 = vsel %vm364_vm11, %v2580_v15, 0.0 }
 0x93a   :  { %1216 = vadd.xlane.f32.xlu0 %v1215_v16 }
 0x950   :  { %1225 = vrot.lane.b32.xlu0 %v2976_v38, %s2751_s27 }
 0x954   :  { %1313 = vrot.lane.b32.xlu0 %v2976_v38, %s2750_s3 }
 0x9bf   :  { %v1220_v17 = vpop.xlane.xlu0 %1219 }
 0x9c0   :  { %2581 = vrcp.f32 %v1220_v17 }
 0x9c3   :  { %v1217_v18 = vpop.xlane.xlu0 %1216 }
 0x9c4   :  { %2583 = vrcp.f32 %v1217_v18 }
 0x9c7   :  { %v1226_v19 = vpop.permute.xlu0 %1225 }
 0x9c8   :  { %2455 = vmatprep.subr.mxu0 %v1226_v19 }
 0x9c9   :  { %2456 = vmatpush3.msra.mxu0 %v1226_v19 }
 0x9ca   :  { %2460 = vmatprep.subr.msk.mxu0 %vm280_vm9, %v1320_v20 }
 0x9cb   :  { %v1314_v25 = vpop.permute.xlu0 %1313 }
 0x9cd   :  { %v2582_v21 = vpop.eup %2581 }
 0x9ce   :  { %v1224_v24 = vmul.f32 %v2582_v21, %v2578_v13 }
 0x9d1   :  { %v2584_v22 = vpop.eup %2583 }
 0x9d2   :  { %v1222_v23 = vmul.f32 %v2584_v22, %v2580_v15 }
 0x9d4   :  { %2457 = vmatprep.mubr.msk.f32.mxu0 %vm364_vm11, %v1222_v23 }
 0x9d5   :  { %2458 = vmatmul.mubr.msk.f32.vlgmr.msra.gmra.mxu0 %vm364_vm11, %v1224_v24 }
 0x9d6   :  { %2461 = vmatpush3.xpose.msk.msra.mxu0 %vm280_vm9, %v1320_v20  ;;  %2464 = vmatprep.mubr.msk.f32.mxu0 %vm280_vm9, %v1314_v25 }
 0x9d7   :  { %2462 = vmatprep.subr.msk.mxu0 %vm280_vm9, %v1318_v26 }
 0x9da   :  { %2463 = vmatpush3.xpose.msk.msra.mxu0 %vm280_vm9, %v1318_v26 }
 0x9dd   :  { %2465 = vmatmul.mubr.msk.f32.vlgmr.msra.gmra.mxu0 %vm280_vm9, %v1316_v27 }
 0xa95   :  { %v3026_v28 = vpop.f32.mrf.mxu0 }
 0xa97   :  { %v3028_v29 = vpop.f32.mrf.mxu0 }
 0xa9d   :  { %v2466_v32 = vpop.f32.mrf.mxu0 }
 0xa9e   :  { %v1407_v33 = vsel %vm368_vm10, %v2466_v32, -inf }
 0xa9f   :  { %1408 = vmax.xlane.f32.xlu1 %v1407_v33  ;;  %v1395_v34 = vpop.f32.mrf.mxu0 }
 0xaa0   :  { %v1404_v35 = vsel %vm364_vm11, %v1395_v34, -inf }
 0xaa1   :  { %1405 = vmax.xlane.f32.xlu0 %v1404_v35 }
 0xab0   :  { %1428 = vrot.lane.b32.xlu1 %v2970_v36, %s2752_s28 }
 0xab4   :  { %1520 = vrot.lane.b32.xlu1 %v2970_v36, %s2753_s29 }
 0xab8   :  { %1518 = vrot.lane.b32.xlu1 %v2976_v38, %s2753_s29 }
 0xabc   :  { %1516 = vrot.lane.b32.xlu1 %v2970_v36, %s2754_s30 }
 0xb28   :  { %v1409_v37 = vpop.xlane.xlu1 %1408 }
 0xb29   :  { %v1411_v39 = vsub.f32 %v2466_v32, %v1409_v37 }
 0xb2a   :  { %v1406_v40 = vpop.xlane.xlu0 %1405 }
 0xb2b   :  { %v1414_v41 = vmul.f32 1.442695, %v1411_v39  ;;  %v1410_v42 = vsub.f32 %v1395_v34, %v1406_v40 }
 0xb2c   :  { %v1429_v43 = vpop.permute.xlu1 %1428 }
 0xb2d   :  { %2585 = vpow2.f32 %v1414_v41  ;;  %v1412_v44 = vmul.f32 1.442695, %v1410_v42  ;;  %2467 = vmatprep.subr.msk.mxu1 %vm129_vm7, %v1429_v43 }
 0xb2e   :  { %2468 = vmatpush3.msk.msra.mxu1 %vm129_vm7, %v1429_v43 }
 0xb2f   :  { %2587 = vpow2.f32 %v1412_v44 }
 0xb30   :  { %v1521_v50 = vpop.permute.xlu1 %1520 }
 0xb34   :  { %v1519_v56 = vpop.permute.xlu1 %1518 }
 0xb38   :  { %v1517_v58 = vpop.permute.xlu1 %1516 }
 0xb3a   :  { %v2586_v4 = vpop.eup %2585 }
 0xb3b   :  { %v1419_v1 = vsel %vm368_vm10, %v2586_v4, 0.0 }
 0xb3c   :  { %v2588_v45 = vpop.eup %2587  ;;  %1420 = vadd.xlane.f32.xlu0 %v1419_v1 }
 0xb3d   :  { %v1416_v46 = vsel %vm364_vm11, %v2588_v45, 0.0 }
 0xb40   :  { %1417 = vadd.xlane.f32.xlu0 %v1416_v46 }
 0xb56   :  { %1426 = vrot.lane.b32.xlu0 %v2976_v38, %s2752_s28 }
 0xb5a   :  { %1514 = vrot.lane.b32.xlu0 %v2976_v38, %s2754_s30 }
 0xbc5   :  { %v1421_v47 = vpop.xlane.xlu0 %1420 }
 0xbc6   :  { %2589 = vrcp.f32 %v1421_v47 }
 0xbc9   :  { %v1418_v48 = vpop.xlane.xlu0 %1417 }
 0xbca   :  { %2591 = vrcp.f32 %v1418_v48 }
 0xbcd   :  { %v1427_v49 = vpop.permute.xlu0 %1426 }
 0xbce   :  { %2469 = vmatprep.subr.mxu1 %v1427_v49 }
 0xbcf   :  { %2470 = vmatpush3.msra.mxu1 %v1427_v49 }
 0xbd0   :  { %2474 = vmatprep.subr.msk.mxu1 %vm280_vm9, %v1521_v50 }
 0xbd1   :  { %v1515_v55 = vpop.permute.xlu0 %1514 }
 0xbd3   :  { %v2590_v51 = vpop.eup %2589 }
 0xbd4   :  { %v1425_v54 = vmul.f32 %v2590_v51, %v2586_v4 }
 0xbd7   :  { %v2592_v52 = vpop.eup %2591 }
 0xbd8   :  { %v1423_v53 = vmul.f32 %v2592_v52, %v2588_v45 }
 0xbda   :  { %2471 = vmatprep.mubr.msk.f32.mxu1 %vm364_vm11, %v1423_v53 }
 0xbdb   :  { %2472 = vmatmul.mubr.msk.f32.vlgmr.msra.gmra.mxu1 %vm364_vm11, %v1425_v54  ;;  %v1956_v54 = vld [vmem:[#allocation8 + $0x18] sm:$0xff] }
 0xbdc   :  { %2475 = vmatpush3.xpose.msk.msra.mxu1 %vm280_vm9, %v1521_v50  ;;  %2478 = vmatprep.mubr.msk.f32.mxu1 %vm280_vm9, %v1515_v55  ;;  %v1954_v55 = vld [vmem:[#allocation8 + $0x8] sm:$0xff] }
 0xbdd   :  { %2476 = vmatprep.subr.msk.mxu1 %vm280_vm9, %v1519_v56 }
 0xbe0   :  { %2477 = vmatpush3.xpose.msk.msra.mxu1 %vm280_vm9, %v1519_v56 }
 0xbe3   :  { %2479 = vmatmul.mubr.msk.f32.vlgmr.msra.gmra.mxu1 %vm280_vm9, %v1517_v58  ;;  %v1953_v58 = vld [vmem:[#allocation8] sm:$0xff] }
 0xc9b   :  { %v3056_v59 = vpop.f32.mrf.mxu1 }
 0xc9d   :  { %v3058_v3 = vpop.f32.mrf.mxu1 }
 0xca3   :  { %v2480_v5 = vpop.f32.mrf.mxu1 }
 0xca4   :  { %v1608_v6 = vsel %vm368_vm10, %v2480_v5, -inf }
 0xca5   :  { %1609 = vmax.xlane.f32.xlu1 %v1608_v6  ;;  %v1596_v7 = vpop.f32.mrf.mxu1  ;;  %v2761_v6 = vmov 1966171168  }
 0xca6   :  { %v1605_v8 = vsel %vm364_vm11, %v1596_v7, -inf }
 0xca7   :  { %1606 = vmax.xlane.f32.xlu0 %v1605_v8  ;;  %v2058_v8 = vlaneseq }
 0xcb6   :  { %1629 = vrot.lane.b32.xlu1 %v2970_v36, %s2755_s7 }
 0xcba   :  { %1721 = vrot.lane.b32.xlu1 %v2970_v36, %s2756_s8 }
 0xcbe   :  { %1719 = vrot.lane.b32.xlu1 %v2976_v38, %s2756_s8 }
 0xcc2   :  { %1717 = vrot.lane.b32.xlu1 %v2970_v36, %s2757_s9 }
 0xd2e   :  { %v1610_v9 = vpop.xlane.xlu1 %1609 }
 0xd2f   :  { %v1612_v10 = vsub.f32 %v2480_v5, %v1610_v9 }
 0xd30   :  { %v1607_v11 = vpop.xlane.xlu0 %1606 }
 0xd31   :  { %v1615_v12 = vmul.f32 1.442695, %v1612_v10  ;;  %v1611_v13 = vsub.f32 %v1596_v7, %v1607_v11  ;;  %v2056_v7 = vunpack.c.l.s4 %v2761_v6  ;;  %v2059_v11 = vshrl.u32 %v2058_v8, 7 }
 0xd32   :  { %v1630_v14 = vpop.permute.xlu1 %1629 }
 0xd33   :  { %2593 = vpow2.f32 %v1615_v12  ;;  %v1613_v15 = vmul.f32 1.442695, %v1611_v13  ;;  %2481 = vmatprep.subr.msk.mxu0 %vm129_vm7, %v1630_v14  ;;  %v2057_v10 = vunpack.c.0.s8 %v2056_v7  ;;  %v2291_v12 = vld [vmem:[#allocation10] ss:$0 sm:$0xff] }
 0xd34   :  { %2482 = vmatpush3.msk.msra.mxu0 %vm129_vm7, %v1630_v14 }
 0xd35   :  { %2595 = vpow2.f32 %v1613_v15  ;;  %v3134_v13 = vsub.s32 %v2057_v10, %v2059_v11 }
 0xd36   :  { %v1722_v23 = vpop.permute.xlu1 %1721 }
 0xd3a   :  { %v1720_v33 = vpop.permute.xlu1 %1719 }
 0xd3e   :  { %v1718_v34 = vpop.permute.xlu1 %1717 }
 0xd40   :  { %v2594_v16 = vpop.eup %2593 }
 0xd41   :  { %v1620_v17 = vsel %vm368_vm10, %v2594_v16, 0.0 }
 0xd42   :  { %v2596_v18 = vpop.eup %2595  ;;  %1621 = vadd.xlane.f32.xlu0 %v1620_v17 }
 0xd43   :  { %v1617_v19 = vsel %vm364_vm11, %v2596_v18, 0.0 }
 0xd46   :  { %1618 = vadd.xlane.f32.xlu0 %v1617_v19 }
 0xd5c   :  { %1627 = vrot.lane.b32.xlu0 %v2976_v38, %s2755_s7 }
 0xd60   :  { %1715 = vrot.lane.b32.xlu0 %v2976_v38, %s2757_s9 }
 0xdcb   :  { %v1622_v20 = vpop.xlane.xlu0 %1621 }
 0xdcc   :  { %2597 = vrcp.f32 %v1622_v20 }
 0xdcf   :  { %v1619_v21 = vpop.xlane.xlu0 %1618 }
 0xdd0   :  { %2599 = vrcp.f32 %v1619_v21 }
 0xdd3   :  { %v1628_v22 = vpop.permute.xlu0 %1627 }
 0xdd4   :  { %2483 = vmatprep.subr.mxu0 %v1628_v22 }
 0xdd5   :  { %2484 = vmatpush3.msra.mxu0 %v1628_v22 }
 0xdd6   :  { %2488 = vmatprep.subr.msk.mxu0 %vm280_vm9, %v1722_v23 }
 0xdd7   :  { %v1716_v32 = vpop.permute.xlu0 %1715 }
 0xdd9   :  { %v2598_v24 = vpop.eup %2597 }
 0xdda   :  { %v1626_v27 = vmul.f32 %v2598_v24, %v2594_v16 }
 0xddd   :  { %v2600_v25 = vpop.eup %2599 }
 0xdde   :  { %v1624_v26 = vmul.f32 %v2600_v25, %v2596_v18 }
 0xde0   :  { %2485 = vmatprep.mubr.msk.f32.mxu0 %vm364_vm11, %v1624_v26 }
 0xde1   :  { %2486 = vmatmul.mubr.msk.f32.vlgmr.msra.gmra.mxu0 %vm364_vm11, %v1626_v27 }
 0xde2   :  { %2489 = vmatpush3.xpose.msk.msra.mxu0 %vm280_vm9, %v1722_v23  ;;  %2492 = vmatprep.mubr.msk.f32.mxu0 %vm280_vm9, %v1716_v32 }
 0xde3   :  { %2490 = vmatprep.subr.msk.mxu0 %vm280_vm9, %v1720_v33 }
 0xde6   :  { %2491 = vmatpush3.xpose.msk.msra.mxu0 %vm280_vm9, %v1720_v33 }
 0xde9   :  { %2493 = vmatmul.mubr.msk.f32.vlgmr.msra.gmra.mxu0 %vm280_vm9, %v1718_v34 }
 0xea1   :  { %v3086_v35 = vpop.f32.mrf.mxu0 }
 0xea3   :  { %v1706_v37 = vpop.f32.mrf.mxu0 }
 0xea9   :  { %v2494_v39 = vpop.f32.mrf.mxu0 }
 0xeaa   :  { %v1809_v40 = vsel %vm368_vm10, %v2494_v39, -inf }
 0xeab   :  { %1810 = vmax.xlane.f32.xlu1 %v1809_v40  ;;  %v1797_v41 = vpop.f32.mrf.mxu0 }
 0xeac   :  { %v1806_v42 = vsel %vm364_vm11, %v1797_v41, -inf }
 0xead   :  { %1807 = vmax.xlane.f32.xlu0 %v1806_v42 }
 0xebc   :  { %1830 = vrot.lane.b32.xlu1 %v2970_v36, %s2758_s10 }
 0xec0   :  { %1081 = vrot.lane.b32.xlu1 %v2933_v2, %s2739_s25 }
 0xec4   :  { %1089 = vrot.lane.b32.xlu1 %v2963_v31, %s2759_s1 }
 0xec8   :  { %1097 = vrot.lane.b32.xlu1 %v2998_v57, %s2760_s13 }
 0xecc   :  { %1083 = vrot.lane.b32.xlu1 %v2931_v63, %s2739_s25 }
 0xed0   :  { %1091 = vrot.lane.b32.xlu1 %v2961_v30, %s2759_s1 }
 0xed4   :  { %1920 = vrot.lane.b32.xlu1 %v3056_v59, %s2739_s25 }
 0xf34   :  { %v1811_v36 = vpop.xlane.xlu1 %1810 }
 0xf35   :  { %v1813_v43 = vsub.f32 %v2494_v39, %v1811_v36 }
 0xf36   :  { %v1808_v2 = vpop.xlane.xlu0 %1807 }
 0xf37   :  { %v1816_v44 = vmul.f32 1.442695, %v1813_v43  ;;  %v1812_v4 = vsub.f32 %v1797_v41, %v1808_v2 }
 0xf38   :  { %v1831_v1 = vpop.permute.xlu1 %1830 }
 0xf39   :  { %2601 = vpow2.f32 %v1816_v44  ;;  %v1814_v31 = vmul.f32 1.442695, %v1812_v4  ;;  %2495 = vmatprep.subr.msk.mxu1 %vm129_vm7, %v1831_v1 }
 0xf3a   :  { %2496 = vmatpush3.msk.msra.mxu1 %vm129_vm7, %v1831_v1 }
 0xf3b   :  { %2603 = vpow2.f32 %v1814_v31 }
 0xf3c   :  { %v1082_v49 = vpop.permute.xlu1 %1081 }
 0xf3d   :  { %v1103_v59 = vsel %vm280_vm9, %v2929_v62, %v1082_v49 }
 0xf40   :  { %v1090_v52 = vpop.permute.xlu1 %1089 }
 0xf44   :  { %v1098_v56 = vpop.permute.xlu1 %1097 }
 0xf46   :  { %v2602_v63 = vpop.eup %2601 }
 0xf47   :  { %v1821_v57 = vsel %vm368_vm10, %v2602_v63, 0.0 }
 0xf48   :  { %v2604_v30 = vpop.eup %2603  ;;  %1822 = vadd.xlane.f32.xlu0 %v1821_v57 }
 0xf49   :  { %v1818_v45 = vsel %vm364_vm11, %v2604_v30, 0.0 }
 0xf4c   :  { %1819 = vadd.xlane.f32.xlu0 %v1818_v45 }
 0xf62   :  { %1828 = vrot.lane.b32.xlu0 %v2976_v38, %s2758_s10 }
 0xf66   :  { %1918 = vrot.lane.b32.xlu0 %v3058_v3, %s2739_s25  ;;  %v1106_v3 = vsel %vm1105_vm13, %v1103_v59, %v1090_v52  ;;  %s2762_s25 = smov [#allocation11]  }
 0xf67   :  { %v1109_v5 = vsel %vm1108_vm14, %v1106_v3, %v1098_v56  ;;  %s2217_s14 = sshll.u32 %s2762_s25, 4  ;;  %s2218_s14 = int_to_ptr.vmem [resolvable:$true] %s2217_s14 }
 0xf68   :  { %s2709_s15 = scalar_lea.vmem %s2218_s14, 288  ;;  %p2714_p12 = scmp.lt.s32.totalorder %s2218_s14, %s2218_s14 }
 0xf69   :  { %p2710_p11 = scmp.ne.s32.totalorder %s2218_s14, %s2709_s15  ;;  %p2715_p13 = scmp.lt.s32.totalorder %s2709_s15, %s2709_s15 }
 0xf6a   :  { %1926 = vrot.lane.b32.xlu0 %v1706_v37, %s2759_s1 }
 0xf6b   :  { %p2716_p0 = por %p2715_p13, %p2714_p12 }
 0xf6d   :  { %p2717_p1 = pnand %p2716_p0, %p2710_p11 }
 0xf6e   :  { %1099 = vrot.lane.b32.xlu0 %v2996_v61, %s2760_s13  ;;  %v1955_v61 = vld [vmem:[#allocation8 + $0x10] sm:$0xff] }
 0xfd1   :  { %v1823_v46 = vpop.xlane.xlu0 %1822 }
 0xfd2   :  { %2605 = vrcp.f32 %v1823_v46 }
 0xfd5   :  { %v1820_v47 = vpop.xlane.xlu0 %1819 }
 0xfd6   :  { %2607 = vrcp.f32 %v1820_v47 }
 0xfd9   :  { %v1829_v48 = vpop.permute.xlu0 %1828 }
 0xfda   :  { %2497 = vmatprep.subr.mxu1 %v1829_v48 }
 0xfdb   :  { %2498 = vmatpush3.msra.mxu1 %v1829_v48 }
 0xfdc   :  { %2502 = vmatprep.subr.mxu1 %v2746_v0 }
 0xfdd   :  { %v1919_v34 = vpop.permute.xlu0 %1918 }
 0xfde   :  { %v1940_v41 = vsel %vm280_vm9, %v3028_v29, %v1919_v34 }
 0xfdf   :  { %v2606_v50 = vpop.eup %2605 }
 0xfe0   :  { %v1827_v53 = vmul.f32 %v2606_v50, %v2602_v63 }
 0xfe1   :  { %v1927_v37 = vpop.permute.xlu0 %1926 }
 0xfe2   :  { %v1942_v42 = vsel %vm1105_vm13, %v1940_v41, %v1927_v37 }
 0xfe3   :  { %v2608_v38 = vpop.eup %2607 }
 0xfe4   :  { %v1825_v51 = vmul.f32 %v2608_v38, %v2604_v30 }
 0xfe5   :  { %v1100_v40 = vpop.permute.xlu0 %1099 }
 0xfe6   :  { %2499 = vmatprep.mubr.msk.f32.mxu1 %vm364_vm11, %v1825_v51 }
 0xfe7   :  { %2500 = vmatmul.mubr.msk.f32.vlgmr.msra.gmra.mxu1 %vm364_vm11, %v1827_v53 }
 0xfe8   :  { %2503 = vmatpush3.msra.mxu1 %v1956_v54  ;;  %2510 = vmatprep.mubr.msk.f32.mxu1 %vm2747_vm0, %v2746_v0 }
 0xfe9   :  { %2504 = vmatprep.subr.mxu1 %v2746_v0 }
 0xfea   :  { %2505 = vmatpush3.msra.mxu1 %v1955_v61 }
 0xfeb   :  { %2506 = vmatprep.subr.mxu1 %v2746_v0 }
 0xfec   :  { %2507 = vmatpush3.msra.mxu1 %v1954_v55 }
 0xfed   :  { %2508 = vmatprep.subr.mxu1 %v2746_v0 }
 0xfee   :  { %2509 = vmatpush3.msra.mxu1 %v1953_v58 }
 0xfef   :  { %2511 = vmatmul.mubr.msk.f32.vlgmr.msra.gmra.mxu1 %vm185_vm8, %v1109_v5 }
 0xff0   :  { %2513 = vmatprep.mubr.msk.f32.mxu1 %vm2747_vm0, %v2746_v0 }
0x10a7   :  { %v2501_v9 = vpop.f32.mrf.mxu1 }
0x10a8   :  { %1936 = vrot.lane.b32.xlu1 %v2501_v9, %s2760_s13 }
0x10a9   :  { %v1907_v62 = vpop.f32.mrf.mxu1 }
0x10aa   :  { %1934 = vrot.lane.b32.xlu0 %v1907_v62, %s2760_s13 }
0x10ae   :  { %1928 = vrot.lane.b32.xlu0 %v3086_v35, %s2759_s1  ;;  %v1084_v35 = vpop.permute.xlu1 %1083 }
0x10af   :  { %v2038_v14 = vpop.f32.mrf.mxu1  ;;  %v1104_v43 = vsel %vm280_vm9, %v2927_v60, %v1084_v35 }
0x10b0   :  { %v2039_v15 = vadd.f32 %v2291_v12, %v2038_v14 }
0x10b1   :  { %v2512_v16 = vpop.f32.mrf.mxu1 }
0x10b2   :  { %v2054_v17 = vcombine.high %v2039_v15, %v2039_v15  ;;  %v2061_v18 = vrot.slane %v2039_v15, %v3134_v13  ;;  %v1092_v39 = vpop.permute.xlu1 %1091 }
0x10b3   :  { %v1107_v4 = vsel %vm1105_vm13, %v1104_v43, %v1092_v39 }
0x10b4   :  { %v2068_v19 = vrot.slane %v2054_v17, %v3134_v13  ;;  %v2069_v20 = vcombine.high %v2061_v18, %v2061_v18  ;;  %v2077_v21 = vrot.slane %v2061_v18, %v3134_v13  ;;  %v1110_v31 = vsel %vm1108_vm14, %v1107_v4, %v1100_v40 }
0x10b6   :  { %v2070_v22 = vcombine.high %v2068_v19, %v2068_v19  ;;  %v2084_v23 = vrot.slane %v2068_v19, %v3134_v13  ;;  %v2091_v24 = vrot.slane %v2069_v20, %v3134_v13  ;;  %v2099_v25 = vcombine.high %v2077_v21, %v2077_v21  ;;  %2127 = vst.msk [vmem:[#allocation11] sm:$0x1] %vm2126_vm15, %v2077_v21  ;;  %v1921_v2 = vpop.permute.xlu1 %1920 }
0x10b7   :  { %v1941_v63 = vsel %vm280_vm9, %v3026_v28, %v1921_v2 }
0x10b8   :  { %v2098_v26 = vrot.slane %v2070_v22, %v3134_v13  ;;  %v2100_v27 = vcombine.high %v2084_v23, %v2084_v23  ;;  %v2101_v32 = vcombine.high %v2091_v24, %v2091_v24  ;;  %2128 = vst.msk [vmem:[#allocation11 + $0x2] sm:$0x1] %vm2126_vm15, %v2091_v24  ;;  %2129 = vst.msk [vmem:[#allocation11 + $0x4] sm:$0x1] %vm2126_vm15, %v2099_v25 }
0x10b9   :  { %2131 = vst.msk [vmem:[#allocation11 + $0x8] sm:$0x1] %vm2126_vm15, %v2084_v23 }
0x10ba   :  { %v2102_v33 = vcombine.high %v2098_v26, %v2098_v26  ;;  %2130 = vst.msk [vmem:[#allocation11 + $0x6] sm:$0x1] %vm2126_vm15, %v2101_v32  ;;  %2132 = vst.msk [vmem:[#allocation11 + $0xa] sm:$0x1] %vm2126_vm15, %v2098_v26 }
0x10bb   :  { %2133 = vst.msk [vmem:[#allocation11 + $0xc] sm:$0x1] %vm2126_vm15, %v2100_v27 }
0x10bc   :  { %2134 = vst.msk [vmem:[#allocation11 + $0xe] sm:$0x1] %vm2126_vm15, %v2102_v33 }
0x111a   :  { %v1937_v30 = vpop.permute.xlu1 %1936 }
0x111c   :  { %v1935_v36 = vpop.permute.xlu0 %1934 }
0x111d   :  { %v1944_v44 = vsel %vm1108_vm14, %v1942_v42, %v1935_v36 }
0x111e   :  { %v1948_v1 = vrot.slane %v1944_v44, 7 }
0x1120   :  { %v1929_v57 = vpop.permute.xlu0 %1928  ;;  %v1952_v29 = vsel %vm129_vm7, %v1110_v31, %v1948_v1 }
0x1121   :  { %v1943_v45 = vsel %vm1105_vm13, %v1941_v63, %v1929_v57  ;;  %2514 = vmatmul.mubr.msk.f32.gmra.mxu1 %vm185_vm8, %v1952_v29 }
0x1122   :  { %v1945_v60 = vsel %vm1108_vm14, %v1943_v45, %v1937_v30  ;;  %2516 = vmatprep.mubr.msk.f32.mxu1 %vm2747_vm0, %v2746_v0 }
0x1123   :  { %v1949_v46 = vrot.slane %v1945_v60, 7 }
0x1125   :  { %v1950_v47 = vsel %vm129_vm7, %v1948_v1, %v1949_v46 }
0x1126   :  { %2517 = vmatmul.mubr.msk.f32.gmra.mxu1 %vm185_vm8, %v1950_v47 }
0x11e1   :  { %v2043_v48 = vpop.f32.mrf.mxu1 }
0x11e2   :  { %v2044_v28 = vadd.f32 %v2291_v12, %v2043_v48 }
0x11e3   :  { %v2515_v49 = vpop.f32.mrf.mxu1 }
0x11e4   :  { %v2109_v50 = vrot.slane %v2044_v28, %v3134_v13  ;;  %v2137_v38 = vcombine.high %v2044_v28, %v2044_v28 }
0x11e6   :  { %v2116_v51 = vrot.slane %v2109_v50, %v3134_v13  ;;  %v2144_v52 = vrot.slane %v2137_v38, %v3134_v13  ;;  %v2145_v53 = vcombine.high %v2109_v50, %v2109_v50  ;;  %v2048_v54 = vpop.f32.mrf.mxu1 }
0x11e7   :  { %v2049_v61 = vadd.f32 %v2291_v12, %v2048_v54 }
0x11e8   :  { %2135 = vst.msk [vmem:[#allocation11 + $0x10] sm:$0x1] %vm2126_vm15, %v2116_v51  ;;  %v2146_v0 = vcombine.high %v2144_v52, %v2144_v52  ;;  %v2153_v55 = vrot.slane %v2144_v52, %v3134_v13  ;;  %v2160_v56 = vrot.slane %v2145_v53, %v3134_v13  ;;  %v2168_v58 = vcombine.high %v2116_v51, %v2116_v51  ;;  %v2518_v59 = vpop.f32.mrf.mxu1 }
0x11e9   :  { %v2178_v3 = vrot.slane %v2049_v61, %v3134_v13 }
0x11ea   :  { %v2167_v5 = vrot.slane %v2146_v0, %v3134_v13  ;;  %v2169_v6 = vcombine.high %v2153_v55, %v2153_v55  ;;  %v2170_v7 = vcombine.high %v2160_v56, %v2160_v56  ;;  %2203 = vst.msk [vmem:[#allocation11 + $0x1] sm:$0x1] %vm2126_vm15, %v2160_v56  ;;  %2204 = vst.msk [vmem:[#allocation11 + $0x3] sm:$0x1] %vm2126_vm15, %v2168_v58 }
0x11eb   :  { %2206 = vst.msk [vmem:[#allocation11 + $0x7] sm:$0x1] %vm2126_vm15, %v2153_v55  ;;  %v2179_v8 = vcombine.high %v2178_v3, %v2178_v3  ;;  %v2186_v9 = vrot.slane %v2178_v3, %v3134_v13 }
0x11ec   :  { %v2171_v62 = vcombine.high %v2167_v5, %v2167_v5  ;;  %2205 = vst.msk [vmem:[#allocation11 + $0x5] sm:$0x1] %vm2126_vm15, %v2170_v7  ;;  %2207 = vst.msk [vmem:[#allocation11 + $0x9] sm:$0x1] %vm2126_vm15, %v2167_v5 }
0x11ed   :  { %2208 = vst.msk [vmem:[#allocation11 + $0xb] sm:$0x1] %vm2126_vm15, %v2169_v6  ;;  %v2193_v10 = vrot.slane %v2179_v8, %v3134_v13  ;;  %2210 = vst.msk [vmem:[#allocation11 + $0xf] sm:$0x1] %vm2126_vm15, %v2186_v9 }
0x11ee   :  { %2209 = vst.msk [vmem:[#allocation11 + $0xd] sm:$0x1] %vm2126_vm15, %v2171_v62 }
0x11ef   :  { %2211 = vst.msk [vmem:[#allocation11 + $0x11] sm:$0x1] %vm2126_vm15, %v2193_v10 }
0x11f0   :  { %2720 = shalt.err (!%p2717_p1)
}
0x11f1   :  { %2223 = dma.vmem_to_hbm [thread:$0]  %s2218_s14, 288, %s3199_s6, [#allocation4], %s2742_s11, %s2742_s11, %s2743_s12  }
0x11f2   :  { %2735 = dma.done.wait [#allocation4], 288  }
0x11f3   :  { %2736 = vsyncadd [#allocation4], 4294967008 }
0x11f4   :  { %2227 = vsyncpa [#allocation3], 1 }
0x11f5   :  { %2228 = vsyncpa [#allocation6], 1 }
0x11f6   :  { %2229 = vsyncpa [#allocation9], 1 }
0x11f7   :  { %2230 = vsyncpa [#allocation4], 1 }

</bundles_post_ra>
